<compile_context>
chip_gen: v5e
topology: v5e:2x2
jax: 0.10.0
libtpu: 0.0.40
codegen_flags: <defaults>
</compile_context>

<pallas_src>
import functools

import jax
import jax.numpy as jnp
from jax.experimental import pallas as pl
from jax.experimental.pallas import tpu as pltpu

# ----------------------------- configuration -------------------------------
PATCH = 4                  # surrogate "stem" patch size
STEM_DIM = 128             # surrogate backbone channel dim
FEAT_DIM = 256             # self.cnn.classifier[2] -> nn.Linear(..., 256)
HIDDEN = 512               # classifier: Linear(512, 512) -> ReLU -> Linear(512, 4)
NUM_CLASSES = 4
K_PAD = 128                # PATCH*PATCH = 16 patch columns zero-padded to one lane tile
OUT_PAD = 128              # 4 classes zero-padded to one lane tile (unmasked vst)
BIAS_LANES = STEM_DIM + FEAT_DIM + HIDDEN + OUT_PAD   # 1024 packed bias lanes


# ------------------------------- fused kernel --------------------------------
def siamese_fused_kernel(patches_ref, ws_ref, wc_ref, w1_ref, w2_ref, biases_ref,
                         out_ref, feat_ref, *, n_patches):
    """One grid step = one branch x one tile of images through the backbone; the
    classifier runs once, on the final grid step, over the resident feature scratch.

    patches_ref: (TILE_IMGS*P, K_PAD) bf16    ws_ref: (K_PAD, STEM_DIM) bf16
    wc_ref:      (STEM_DIM, FEAT_DIM) bf16    w1_ref: (512, 512) bf16
    w2_ref:      (512, OUT_PAD) bf16          biases_ref: (1, 1024) f32 (packed)
    out_ref:     (B_pad, OUT_PAD) f32         feat_ref: (2, B_pad, FEAT_DIM) f32 scratch
    """
    br = pl.program_id(0)                 # branch: 0 = x1, 1 = x2 (shared weights)
    t = pl.program_id(1)                  # image tile within the branch
    tile_rows = patches_ref.shape[0]
    tile_imgs = tile_rows // n_patches

    # packed biases -> static 128-lane-aligned slices
    b_stem = biases_ref[:, :STEM_DIM]
    b_cls = biases_ref[:, STEM_DIM:STEM_DIM + FEAT_DIM]

    # --- surrogate CNN backbone: patch embed -> GELU -> per-image mean pool -> Linear(256)
    h = jnp.dot(patches_ref[...], ws_ref[...],
                preferred_element_type=jnp.float32) + b_stem              # (rows, 128) f32
    h = jax.nn.gelu(h)       # tanh-approx; kept f32 so v5e's non-bf16 VPU/EUP path is legal
    pooled = jnp.mean(h.reshape(tile_imgs, n_patches, STEM_DIM), axis=1)  # (tile_imgs, 128)
    # Linear(256) with the attention value projection pre-folded in (wc = w_cls @ wv);
    # exact because seq_len == 1 => softmax == 1 and this MHA has no output projection.
    feat = jnp.dot(pooled.astype(jnp.bfloat16), wc_ref[...],
                   preferred_element_type=jnp.float32) + b_cls            # (tile_imgs, 256)

    off = pl.multiple_of(t * tile_imgs, 8)       # tile_imgs is a multiple of 8
    feat_ref[br, pl.ds(off, tile_imgs), :] = feat

    # --- classifier on the last grid step: split-K replaces torch.cat((o1, o2), dim=1)
    @pl.when((br == pl.num_programs(0) - 1) & (t == pl.num_programs(1) - 1))
    def _():
        b1 = biases_ref[:, STEM_DIM + FEAT_DIM:STEM_DIM + FEAT_DIM + HIDDEN]
        b2 = biases_ref[:, STEM_DIM + FEAT_DIM + HIDDEN:]
        v0 = feat_ref[0].astype(jnp.bfloat16)                             # (B_pad, 256)
        v1 = feat_ref[1].astype(jnp.bfloat16)
        hid = (jnp.dot(v0, w1_ref[:FEAT_DIM, :], preferred_element_type=jnp.float32)
               + jnp.dot(v1, w1_ref[FEAT_DIM:, :], preferred_element_type=jnp.float32)
               + b1)                                                      # (B_pad, 512)
        hid = jnp.maximum(hid, 0.0)
        out_ref[...] = jnp.dot(hid.astype(jnp.bfloat16), w2_ref[...],
                               preferred_element_type=jnp.float32) + b2


# ------------------------------ host-side glue --------------------------------
def _patchify(x):
    """(N, 1, H, W) f32 -> (N*P, PATCH*PATCH) patch rows.  Single channel only:
    the x.repeat(1, 3, 1, 1) of the original module is folded into w_stem at init."""
    n, c, hh, ww = x.shape
    assert c == 1 and hh % PATCH == 0 and ww % PATCH == 0, "H, W must be multiples of PATCH"
    gh, gw = hh // PATCH, ww // PATCH
    p = x.reshape(n, gh, PATCH, gw, PATCH).transpose(0, 1, 3, 2, 4)
    return p.reshape(n * gh * gw, PATCH * PATCH)


def _choose_tile_imgs(batch, n_patches, vmem_budget_bytes=16 * 1024 * 1024):
    """Images per grid step: as many as fit a per-step VMEM budget sized for v7x
    (64 MiB physical / 32 MiB scoped), a multiple of 8, capped at 512."""
    per_img = n_patches * (2 * 2 * K_PAD + 4 * STEM_DIM)   # 2x-buffered bf16 patches + f32 h
    tile = max(8, min((vmem_budget_bytes // per_img) // 8 * 8, 512))
    b_pad8 = ((batch + 7) // 8) * 8                        # sublane-aligned per-branch batch
    tile = min(tile, b_pad8)
    b_pad = ((b_pad8 + tile - 1) // tile) * tile           # per-branch batch = multiple of tile
    return tile, b_pad


def siamese_forward(x1, x2, params):
    """x1, x2: (B, 1, H, W) f32 (NCHW).  Returns (B, 4) f32 logits."""
    b, _, hh, ww = x1.shape
    p = (hh // PATCH) * (ww // PATCH)
    tile_imgs, b_pad = _choose_tile_imgs(b, p)
    tile_rows = tile_imgs * p

    def prep(x):
        x = jnp.pad(x, ((0, b_pad - b), (0, 0), (0, 0), (0, 0)))         # pad batch rows
        pt = _patchify(x)                                                 # (b_pad*P, 16)
        pt = jnp.pad(pt, ((0, 0), (0, K_PAD - pt.shape[-1])))             # lane-pad K to 128
        return pt.astype(jnp.bfloat16)

    patches = jnp.stack([prep(x1), prep(x2)], axis=0)                     # (2, b_pad*P, K_PAD)

    grid = (2, b_pad // tile_imgs)
    kernel = functools.partial(siamese_fused_kernel, n_patches=p)

    out_padded = pl.pallas_call(
        kernel,
        out_shape=jax.ShapeDtypeStruct((b_pad, OUT_PAD), jnp.float32),
        grid=grid,
        in_specs=[
            # patches: blocked over (branch, image tile); branch dim squeezed out
            pl.BlockSpec((None, tile_rows, K_PAD), lambda br, t: (br, t, 0)),
            # weights: constant index_maps -> stay VMEM-resident across the grid
            pl.BlockSpec((K_PAD, STEM_DIM), lambda br, t: (0, 0)),
            pl.BlockSpec((STEM_DIM, FEAT_DIM), lambda br, t: (0, 0)),
            pl.BlockSpec((2 * FEAT_DIM, HIDDEN), lambda br, t: (0, 0)),
            pl.BlockSpec((HIDDEN, OUT_PAD), lambda br, t: (0, 0)),
            pl.BlockSpec((1, BIAS_LANES), lambda br, t: (0, 0)),
        ],
        out_specs=pl.BlockSpec((b_pad, OUT_PAD), lambda br, t: (0, 0)),   # resident output
        scratch_shapes=[pltpu.VMEM((2, b_pad, FEAT_DIM), jnp.float32)],   # feature carry
        compiler_params=pltpu.CompilerParams(
            dimension_semantics=("arbitrary", "arbitrary"),
            vmem_limit_bytes=32 * 1024 * 1024),
    )(patches, params['w_stem'], params['w_cls_v'], params['w1'], params['w2'],
      params['biases'])
    return out_padded[:b, :NUM_CLASSES]                                   # (B, 4)


# --------------------------- deterministic params ----------------------------
def init_params(key):
    ks = jax.random.split(key, 9)

    def w(kk, shape):
        return jax.random.normal(kk, shape, jnp.float32) * 0.02

    # --- surrogate backbone stem (ConvNeXt-Large stand-in)
    patch_k = PATCH * PATCH
    w_stem3 = w(ks[0], (3 * patch_k, STEM_DIM))        # weights as seen by x.repeat(1,3,1,1)
    # fold the 1->3 channel repeat: repeated input => sum of the three channel blocks (exact)
    w_stem1 = w_stem3[:patch_k] + w_stem3[patch_k:2 * patch_k] + w_stem3[2 * patch_k:]
    w_stem = jnp.zeros((K_PAD, STEM_DIM), jnp.float32).at[:patch_k].set(w_stem1)
    b_stem = w(ks[1], (STEM_DIM,))

    # --- cnn.classifier[2]: Linear(stem_dim, 256)
    w_cls = w(ks[2], (STEM_DIM, FEAT_DIM))
    b_cls = w(ks[3], (FEAT_DIM,))

    # --- MultiHeadAttention(256): at seq_len == 1 softmax == 1 and there is no out_proj,
    #     so attention_output == value(x).  Fold value projection into the Linear (f32).
    wv = w(ks[4], (FEAT_DIM, FEAT_DIM))
    bv = w(ks[5], (FEAT_DIM,))
    w_cls_v = w_cls @ wv                                # f32 compose, single bf16 cast below
    b_cls_v = b_cls @ wv + bv

    # --- classifier: Linear(512, 512) -> ReLU -> Linear(512, 4)
    w1 = w(ks[6], (2 * FEAT_DIM, HIDDEN))
    b1 = w(ks[7], (HIDDEN,))
    w2 = jnp.zeros((HIDDEN, OUT_PAD), jnp.float32).at[:, :NUM_CLASSES].set(
        w(ks[8], (HIDDEN, NUM_CLASSES)))                # zero-padded class columns stay exact
    b2 = jnp.zeros((OUT_PAD,), jnp.float32)

    biases = jnp.concatenate([b_stem, b_cls_v, b1, b2]).reshape(1, BIAS_LANES)

    return dict(
        w_stem=w_stem.astype(jnp.bfloat16),
        w_cls_v=w_cls_v.astype(jnp.bfloat16),
        w1=w1.astype(jnp.bfloat16),
        w2=w2.astype(jnp.bfloat16),
        biases=biases,                                  # single packed f32 bias operand
    )


# --------------------------------- main ---------------------------------------
if __name__ == "__main__":
    B, H, W = 2, 16, 16
    key = jax.random.PRNGKey(0)
    kx1, kx2, kp = jax.random.split(key, 3)
    x1 = jax.random.normal(kx1, (B, 1, H, W), jnp.float32)   # NCHW, single channel
    x2 = jax.random.normal(kx2, (B, 1, H, W), jnp.float32)
    params = init_params(kp)

    out = jax.jit(siamese_forward)(x1, x2, params)
    out = jax.block_until_ready(out)
    assert out.shape == (B, NUM_CLASSES) and out.dtype == jnp.float32
    assert bool(jnp.all(jnp.isfinite(out)))
    print("KERNEL_OK")
</pallas_src>

<mosaic_0001>
module attributes {stable_mosaic.version = 11 : i64} {
  func.func @siamese_fused_kernel(%arg0: i32, %arg1: i32, %arg2: memref<1x128x128xbf16, #tpu.memory_space<vmem>>, %arg3: memref<128x128xbf16, #tpu.memory_space<vmem>>, %arg4: memref<128x256xbf16, #tpu.memory_space<vmem>>, %arg5: memref<512x512xbf16, #tpu.memory_space<vmem>>, %arg6: memref<512x128xbf16, #tpu.memory_space<vmem>>, %arg7: memref<1x1024xf32, #tpu.memory_space<vmem>>, %arg8: memref<8x128xf32, #tpu.memory_space<vmem>>, %arg9: memref<2x8x256xf32, #tpu.memory_space<vmem>>) attributes {dimension_semantics = [#tpu.dimension_semantics<arbitrary>, #tpu.dimension_semantics<arbitrary>], iteration_bounds = array<i64: 2, 1>, scalar_prefetch = 0 : i64, scratch_operands = 1 : i64, tpu.core_type = #tpu.core_type<tc>, window_params = [{transform_indices = @transform_0, window_bounds = array<i64: 1, 128, 128>}, {pipeline_mode = #tpu.pipeline_mode<synchronous>, transform_indices = @transform_1, window_bounds = array<i64: 128, 128>}, {pipeline_mode = #tpu.pipeline_mode<synchronous>, transform_indices = @transform_2, window_bounds = array<i64: 128, 256>}, {pipeline_mode = #tpu.pipeline_mode<synchronous>, transform_indices = @transform_3, window_bounds = array<i64: 512, 512>}, {pipeline_mode = #tpu.pipeline_mode<synchronous>, transform_indices = @transform_4, window_bounds = array<i64: 512, 128>}, {pipeline_mode = #tpu.pipeline_mode<synchronous>, transform_indices = @transform_5, window_bounds = array<i64: 1, 1024>}, {pipeline_mode = #tpu.pipeline_mode<synchronous>, transform_indices = @transform_6, window_bounds = array<i64: 8, 128>}]} {
    %c0 = arith.constant 0 : index
    %c0_0 = arith.constant 0 : index
    %0 = vector.load %arg7[%c0, %c0_0] : memref<1x1024xf32, #tpu.memory_space<vmem>>, vector<1x128xf32>
    %c0_1 = arith.constant 0 : index
    %c128 = arith.constant 128 : index
    %1 = vector.load %arg7[%c0_1, %c128] : memref<1x1024xf32, #tpu.memory_space<vmem>>, vector<1x256xf32>
    %c0_2 = arith.constant 0 : index
    %c0_3 = arith.constant 0 : index
    %c0_4 = arith.constant 0 : index
    %2 = vector.load %arg2[%c0_2, %c0_3, %c0_4] : memref<1x128x128xbf16, #tpu.memory_space<vmem>>, vector<1x128x128xbf16>
    %3 = vector.shape_cast %2 : vector<1x128x128xbf16> to vector<128x128xbf16>
    %c0_5 = arith.constant 0 : index
    %c0_6 = arith.constant 0 : index
    %4 = vector.load %arg3[%c0_5, %c0_6] : memref<128x128xbf16, #tpu.memory_space<vmem>>, vector<128x128xbf16>
    %cst = arith.constant dense<0.000000e+00> : vector<128x128xf32>
    %5 = tpu.matmul %3, %4, %cst {dimension_numbers = #tpu.dot_dimension_numbers<[1], [0], [0], [1], [0, 0, 1, 1], [], []>} : vector<128x128xbf16>, vector<128x128xbf16>, vector<128x128xf32> -> vector<128x128xf32>
    %6 = vector.broadcast %0 : vector<1x128xf32> to vector<128x128xf32>
    %7 = arith.addf %5, %6 : vector<128x128xf32>
    %8 = arith.mulf %7, %7 : vector<128x128xf32>
    %9 = arith.mulf %7, %8 : vector<128x128xf32>
    %cst_7 = arith.constant 4.471500e-02 : f32
    %10 = vector.broadcast %cst_7 : f32 to vector<128x128xf32>
    %11 = arith.mulf %10, %9 : vector<128x128xf32>
    %12 = arith.addf %7, %11 : vector<128x128xf32>
    %cst_8 = arith.constant 0.797884583 : f32
    %13 = vector.broadcast %cst_8 : f32 to vector<128x128xf32>
    %14 = arith.mulf %13, %12 : vector<128x128xf32>
    %15 = math.tanh %14 : vector<128x128xf32>
    %cst_9 = arith.constant 1.000000e+00 : f32
    %16 = vector.broadcast %cst_9 : f32 to vector<128x128xf32>
    %17 = arith.addf %16, %15 : vector<128x128xf32>
    %cst_10 = arith.constant 5.000000e-01 : f32
    %18 = vector.broadcast %cst_10 : f32 to vector<128x128xf32>
    %19 = arith.mulf %18, %17 : vector<128x128xf32>
    %20 = arith.mulf %7, %19 : vector<128x128xf32>
    %21 = vector.shape_cast %20 : vector<128x128xf32> to vector<8x16x128xf32>
    %cst_11 = arith.constant dense<0.000000e+00> : vector<8x128xf32>
    %22 = vector.multi_reduction <add>, %21, %cst_11 [1] : vector<8x16x128xf32> to vector<8x128xf32>
    %cst_12 = arith.constant 1.600000e+01 : f32
    %23 = vector.broadcast %cst_12 : f32 to vector<8x128xf32>
    %24 = arith.divf %22, %23 : vector<8x128xf32>
    %25 = arith.truncf %24 : vector<8x128xf32> to vector<8x128xbf16>
    %c0_13 = arith.constant 0 : index
    %c0_14 = arith.constant 0 : index
    %26 = vector.load %arg4[%c0_13, %c0_14] : memref<128x256xbf16, #tpu.memory_space<vmem>>, vector<128x256xbf16>
    %cst_15 = arith.constant dense<0.000000e+00> : vector<8x256xf32>
    %27 = tpu.matmul %25, %26, %cst_15 {dimension_numbers = #tpu.dot_dimension_numbers<[1], [0], [0], [1], [0, 0, 1, 1], [], []>} : vector<8x128xbf16>, vector<128x256xbf16>, vector<8x256xf32> -> vector<8x256xf32>
    %28 = vector.broadcast %1 : vector<1x256xf32> to vector<8x256xf32>
    %29 = arith.addf %27, %28 : vector<8x256xf32>
    %c8_i32 = arith.constant 8 : i32
    %30 = arith.muli %arg1, %c8_i32 : i32
    %31 = tpu.assume_multiple %30, 8 : i32
    %32 = arith.index_cast %arg0 : i32 to index
    %33 = arith.index_cast %31 : i32 to index
    %c0_16 = arith.constant 0 : index
    %34 = vector.load %arg9[%32, %33, %c0_16] : memref<2x8x256xf32, #tpu.memory_space<vmem>>, vector<1x8x256xf32>
    %35 = vector.shape_cast %34 : vector<1x8x256xf32> to vector<8x256xf32>
    %36 = vector.shape_cast %29 : vector<8x256xf32> to vector<1x8x256xf32>
    tpu.vector_store %arg9[%32, %33, %c0_16], %36 {strides = array<i32>} : memref<2x8x256xf32, #tpu.memory_space<vmem>>, vector<1x8x256xf32>,
    %c1_i32 = arith.constant 1 : i32
    %37 = arith.cmpi eq, %arg0, %c1_i32 : i32
    %c0_i32 = arith.constant 0 : i32
    %38 = arith.cmpi eq, %arg1, %c0_i32 : i32
    %39 = arith.andi %37, %38 : i1
    %40 = arith.extui %39 : i1 to i32
    %c0_i32_17 = arith.constant 0 : i32
    %41 = arith.cmpi ne, %40, %c0_i32_17 : i32
    scf.if %41 {
      %c0_18 = arith.constant 0 : index
      %c384 = arith.constant 384 : index
      %42 = vector.load %arg7[%c0_18, %c384] : memref<1x1024xf32, #tpu.memory_space<vmem>>, vector<1x512xf32>
      %c0_19 = arith.constant 0 : index
      %c896 = arith.constant 896 : index
      %43 = vector.load %arg7[%c0_19, %c896] : memref<1x1024xf32, #tpu.memory_space<vmem>>, vector<1x128xf32>
      %c0_20 = arith.constant 0 : index
      %c0_21 = arith.constant 0 : index
      %c0_22 = arith.constant 0 : index
      %44 = vector.load %arg9[%c0_20, %c0_21, %c0_22] : memref<2x8x256xf32, #tpu.memory_space<vmem>>, vector<1x8x256xf32>
      %45 = vector.shape_cast %44 : vector<1x8x256xf32> to vector<8x256xf32>
      %46 = arith.truncf %45 : vector<8x256xf32> to vector<8x256xbf16>
      %c1 = arith.constant 1 : index
      %c0_23 = arith.constant 0 : index
      %c0_24 = arith.constant 0 : index
      %47 = vector.load %arg9[%c1, %c0_23, %c0_24] : memref<2x8x256xf32, #tpu.memory_space<vmem>>, vector<1x8x256xf32>
      %48 = vector.shape_cast %47 : vector<1x8x256xf32> to vector<8x256xf32>
      %49 = arith.truncf %48 : vector<8x256xf32> to vector<8x256xbf16>
      %c0_25 = arith.constant 0 : index
      %c0_26 = arith.constant 0 : index
      %50 = vector.load %arg5[%c0_25, %c0_26] : memref<512x512xbf16, #tpu.memory_space<vmem>>, vector<256x512xbf16>
      %cst_27 = arith.constant dense<0.000000e+00> : vector<8x512xf32>
      %51 = tpu.matmul %46, %50, %cst_27 {dimension_numbers = #tpu.dot_dimension_numbers<[1], [0], [0], [1], [0, 0, 1, 1], [], []>} : vector<8x256xbf16>, vector<256x512xbf16>, vector<8x512xf32> -> vector<8x512xf32>
      %c256 = arith.constant 256 : index
      %c0_28 = arith.constant 0 : index
      %52 = vector.load %arg5[%c256, %c0_28] : memref<512x512xbf16, #tpu.memory_space<vmem>>, vector<256x512xbf16>
      %cst_29 = arith.constant dense<0.000000e+00> : vector<8x512xf32>
      %53 = tpu.matmul %49, %52, %cst_29 {dimension_numbers = #tpu.dot_dimension_numbers<[1], [0], [0], [1], [0, 0, 1, 1], [], []>} : vector<8x256xbf16>, vector<256x512xbf16>, vector<8x512xf32> -> vector<8x512xf32>
      %54 = arith.addf %51, %53 : vector<8x512xf32>
      %55 = vector.broadcast %42 : vector<1x512xf32> to vector<8x512xf32>
      %56 = arith.addf %54, %55 : vector<8x512xf32>
      %cst_30 = arith.constant 0.000000e+00 : f32
      %57 = vector.broadcast %cst_30 : f32 to vector<8x512xf32>
      %58 = arith.maximumf %56, %57 : vector<8x512xf32>
      %59 = arith.truncf %58 : vector<8x512xf32> to vector<8x512xbf16>
      %c0_31 = arith.constant 0 : index
      %c0_32 = arith.constant 0 : index
      %60 = vector.load %arg6[%c0_31, %c0_32] : memref<512x128xbf16, #tpu.memory_space<vmem>>, vector<512x128xbf16>
      %cst_33 = arith.constant dense<0.000000e+00> : vector<8x128xf32>
      %61 = tpu.matmul %59, %60, %cst_33 {dimension_numbers = #tpu.dot_dimension_numbers<[1], [0], [0], [1], [0, 0, 1, 1], [], []>} : vector<8x512xbf16>, vector<512x128xbf16>, vector<8x128xf32> -> vector<8x128xf32>
      %62 = vector.broadcast %43 : vector<1x128xf32> to vector<8x128xf32>
      %63 = arith.addf %61, %62 : vector<8x128xf32>
      %c0_34 = arith.constant 0 : index
      %c0_35 = arith.constant 0 : index
      %64 = vector.load %arg8[%c0_34, %c0_35] : memref<8x128xf32, #tpu.memory_space<vmem>>, vector<8x128xf32>
      tpu.vector_store %arg8[%c0_34, %c0_35], %63 {strides = array<i32>} : memref<8x128xf32, #tpu.memory_space<vmem>>, vector<8x128xf32>,
    } else {
    }
    return
  }
  func.func @transform_0(%arg0: i32, %arg1: i32) -> (i32, i32, i32) {
    %c0_i32 = arith.constant 0 : i32
    %c0_i32_0 = arith.constant 0 : i32
    return %arg0, %arg1, %c0_i32 : i32, i32, i32
  }
  func.func @transform_1(%arg0: i32, %arg1: i32) -> (i32, i32) {
    %c0_i32 = arith.constant 0 : i32
    %c0_i32_0 = arith.constant 0 : i32
    %c0_i32_1 = arith.constant 0 : i32
    return %c0_i32, %c0_i32_0 : i32, i32
  }
  func.func @transform_2(%arg0: i32, %arg1: i32) -> (i32, i32) {
    %c0_i32 = arith.constant 0 : i32
    %c0_i32_0 = arith.constant 0 : i32
    %c0_i32_1 = arith.constant 0 : i32
    return %c0_i32, %c0_i32_0 : i32, i32
  }
  func.func @transform_3(%arg0: i32, %arg1: i32) -> (i32, i32) {
    %c0_i32 = arith.constant 0 : i32
    %c0_i32_0 = arith.constant 0 : i32
    %c0_i32_1 = arith.constant 0 : i32
    return %c0_i32, %c0_i32_0 : i32, i32
  }
  func.func @transform_4(%arg0: i32, %arg1: i32) -> (i32, i32) {
    %c0_i32 = arith.constant 0 : i32
    %c0_i32_0 = arith.constant 0 : i32
    %c0_i32_1 = arith.constant 0 : i32
    return %c0_i32, %c0_i32_0 : i32, i32
  }
  func.func @transform_5(%arg0: i32, %arg1: i32) -> (i32, i32) {
    %c0_i32 = arith.constant 0 : i32
    %c0_i32_0 = arith.constant 0 : i32
    %c0_i32_1 = arith.constant 0 : i32
    return %c0_i32, %c0_i32_0 : i32, i32
  }
  func.func @transform_6(%arg0: i32, %arg1: i32) -> (i32, i32) {
    %c0_i32 = arith.constant 0 : i32
    %c0_i32_0 = arith.constant 0 : i32
    %c0_i32_1 = arith.constant 0 : i32
    return %c0_i32, %c0_i32_0 : i32, i32
  }
}

</mosaic_0001>

<bundles_post_ra>
// kernel: siamese_forward.1
= control target key start
LH: loop header
LB: loop body
LE: loop exit
PB: predicated region body
PF: predicated region fallthrough
CT: control target
= control target key end

     0   :  { %s3323_s21 = smov 0   ;;  %s3325_s22 = smov 0   ;;  %s4545_s0 = inlined_call_operand.vmem [shape: bf16[2,128,128], index: 0, kind: input, shape index: {}]   ;;  %s4546_s1 = inlined_call_operand.vmem [shape: bf16[128,128], index: 1, kind: input, shape index: {}]   ;;  %s4547_s2 = inlined_call_operand.vmem [shape: bf16[128,256], index: 2, kind: input, shape index: {}]   ;;  %s4548_s3 = inlined_call_operand.vmem [shape: bf16[512,512], index: 3, kind: input, shape index: {}]   ;;  %s4549_s4 = inlined_call_operand.vmem [shape: bf16[512,128], index: 4, kind: input, shape index: {}]   ;;  %s4550_s5 = inlined_call_operand.vmem [shape: f32[1,1024], index: 5, kind: input, shape index: {}]   ;;  %s4551_s6 = inlined_call_operand.vmem [shape: f32[8,128], index: 6, kind: output, shape index: {}]  }
   0x1   :  { %s3327_s23 = smov 0  }
   0x2 LB: > { %s28_s24 = sadd.s32 1, %s3281_s22  ;;  %p2215_p0 = scmp.ge.s32.totalorder %s3285_s23, 1  ;;  %s3285_s23 = sphi %s3327_s23, %s16_s23   ;;  %s3281_s22 = sphi %s3325_s22, %s4553_s22   ;;  %s3277_s21 = sphi %s3323_s21, %s4552_s21  }
   0x3   : > { %p30_p1 = scmp.ge.s32.totalorder %s28_s24, 2  ;;  %p226_p2 = scmp.lt.s32.totalorder %s3285_s23, 3 }
   0x5   : > { %s4555_s24 = smov (%p30_p1, %s28_s24), 0  ;;  %p227_p3 = pnand %p2215_p0, %p226_p2 }
   0x6   : > { %p256_p4 = scmp.lt.s32.totalorder (!%p227_p3), %s3277_s21, 1  ;;  %p839_p5 = scmp.eq.s32.totalorder (!%p227_p3), %s3277_s21, 1 }
   0x7   : > { %230 = sbr.rel (%p227_p3) target bundleno = 792 (0x318), region = 44  ;;  %s3024_s10 = sshll.u32 (!%p227_p3), %s3277_s21, 4 }
   0x8   : > { %s836_s11 = scalar_lea.vmem (!%p227_p3), [#allocation2], %s3024_s10 }
   0xc   : > { %v3007_v0 = vld [vmem:[%s4546_s1 + $0x38] sm:$0xff]  ;;  %v3006_v1 = vld [vmem:[%s4546_s1 + $0x30] sm:$0xff]  ;;  %v3005_v2 = vld [vmem:[%s4546_s1 + $0x28] sm:$0xff]  ;;  %s257_s13 = scalar_select %p256_p4, %s3277_s21, 1  ;;  %vm707_vm1 = vcmask 1041409   ;;  %vm709_vm2 = vcmask 1042434  }
   0xd   : > { %398 = vmatpush.bf16.msra.mxu0 %v3007_v0  ;;  %3186 = vmatpush.bf16.msra.mxu1 %v3007_v0  ;;  %v3004_v3 = vld [vmem:[%s4546_s1 + $0x20] sm:$0xff]  ;;  %v3003_v4 = vld [vmem:[%s4546_s1 + $0x18] sm:$0xff]  ;;  %v3002_v5 = vld [vmem:[%s4546_s1 + $0x10] sm:$0xff]  ;;  %vm711_vm3 = vcmask 1043459   ;;  %vm713_vm4 = vcmask 1044484   ;;  %vm715_vm5 = vcmask 1045509  }
   0xe   : > { %3187 = vmatpush.bf16.msra.mxu3 %v3007_v0  ;;  %v3001_v6 = vld [vmem:[%s4546_s1 + $0x8] sm:$0xff]  ;;  %s2991_s16 = sshll.u32 %s257_s13, 6  ;;  %v3000_v7 = vld [vmem:[%s4546_s1] sm:$0xff]  ;;  %vm717_vm6 = vcmask 1046534   ;;  %vm719_vm7 = vcmask 1047559  }
   0xf   : > { %s263_s25 = scalar_lea.vmem %s4545_s0, %s2991_s16  ;;  %v3375_v16 = vld [vmem:[%s4550_s5] ss:$0 sm:$0xff] }
  0x10   : > { %v2992_v8 = vld [vmem:[%s263_s25] sm:$0xff]  ;;  %v2995_v9 = vld [vmem:[%s263_s25 + $0x18] sm:$0xff]  ;;  %v2997_v10 = vld [vmem:[%s263_s25 + $0x28] sm:$0xff] }
  0x11   : > { %399 = vmatpush.bf16.msra.mxu0 %v3006_v1  ;;  %3188 = vmatpush.bf16.msra.mxu1 %v3006_v1  ;;  %v2993_v11 = vld [vmem:[%s263_s25 + $0x8] sm:$0xff]  ;;  %v2996_v12 = vld [vmem:[%s263_s25 + $0x20] sm:$0xff]  ;;  %v2998_v13 = vld [vmem:[%s263_s25 + $0x30] sm:$0xff] }
  0x12   : > { %3189 = vmatpush.bf16.msra.mxu3 %v3006_v1  ;;  %v2994_v14 = vld [vmem:[%s263_s25 + $0x10] sm:$0xff]  ;;  %v2999_v15 = vld [vmem:[%s263_s25 + $0x38] sm:$0xff] }
  0x15   : > { %400 = vmatpush.bf16.msra.mxu0 %v3005_v2  ;;  %3190 = vmatpush.bf16.msra.mxu1 %v3005_v2 }
  0x16   : > { %3191 = vmatpush.bf16.msra.mxu3 %v3005_v2 }
  0x19   : > { %401 = vmatpush.bf16.msra.mxu0 %v3004_v3  ;;  %3192 = vmatpush.bf16.msra.mxu1 %v3004_v3 }
  0x1a   : > { %3193 = vmatpush.bf16.msra.mxu3 %v3004_v3 }
  0x1d   : > { %402 = vmatpush.bf16.msra.mxu0 %v3003_v4  ;;  %3194 = vmatpush.bf16.msra.mxu1 %v3003_v4 }
  0x1e   : > { %3195 = vmatpush.bf16.msra.mxu3 %v3003_v4 }
  0x21   : > { %403 = vmatpush.bf16.msra.mxu0 %v3002_v5  ;;  %3196 = vmatpush.bf16.msra.mxu1 %v3002_v5 }
  0x22   : > { %3197 = vmatpush.bf16.msra.mxu3 %v3002_v5 }
  0x25   : > { %404 = vmatpush.bf16.msra.mxu0 %v3001_v6  ;;  %3198 = vmatpush.bf16.msra.mxu1 %v3001_v6 }
  0x26   : > { %3199 = vmatpush.bf16.msra.mxu3 %v3001_v6 }
  0x29   : > { %405 = vmatpush.bf16.msra.mxu0 %v3000_v7  ;;  %3200 = vmatpush.bf16.msra.mxu1 %v3000_v7 }
  0x2a   : > { %3201 = vmatpush.bf16.msra.mxu3 %v3000_v7 }
  0x2c   : > { %406 = vmatmul.bf16.vlgmr.msra.gmra.mxu0 %v2992_v8  ;;  %421 = vmatmul.bf16.vlgmr.msra.gmra.mxu1 %v2995_v9 }
  0x2d   : > { %431 = vmatmul.bf16.vlgmr.msra.gmra.mxu3 %v2997_v10 }
  0x3c   : > { %411 = vmatmul.bf16.gmra.mxu0 %v2993_v11  ;;  %426 = vmatmul.bf16.gmra.mxu1 %v2996_v12 }
  0x3d   : > { %436 = vmatmul.bf16.gmra.mxu3 %v2998_v13 }
  0x4c   : > { %416 = vmatmul.bf16.gmra.mxu0 %v2994_v14 }
  0x4d   : > { %441 = vmatmul.bf16.gmra.mxu3 %v2999_v15 }
  0xa9   : > { %v407_v17 = vpop.f32.mrf.mxu0  ;;  %v422_v18 = vpop.f32.mrf.mxu1 }
  0xaa   : > { %v3378_v19 = vadd.f32 %v3375_v16, %v407_v17  ;;  %v3381_v20 = vadd.f32 %v3375_v16, %v422_v18 }
  0xac   : > { %v447_v21 = vmul.f32 %v3378_v19, %v3378_v19  ;;  %v453_v23 = vmul.f32 %v3381_v20, %v3381_v20 }
  0xae   : > { %v463_v27 = vmul.f32 %v447_v21, %v3378_v19  ;;  %v469_v33 = vmul.f32 %v453_v23, %v3381_v20 }
  0xb0   : > { %v432_v22 = vpop.f32.mrf.mxu3  ;;  %v479_v34 = vmul.f32 0.044715, %v463_v27  ;;  %v485_v40 = vmul.f32 0.044715, %v469_v33 }
  0xb1   : > { %v3388_v24 = vadd.f32 %v3375_v16, %v432_v22  ;;  %v409_v25 = vpop.f32.mrf.mxu0  ;;  %v424_v26 = vpop.f32.mrf.mxu1 }
  0xb2   : > { %v3392_v28 = vadd.f32 %v3375_v16, %v409_v25  ;;  %v3395_v29 = vadd.f32 %v3375_v16, %v424_v26  ;;  %v495_v44 = vadd.f32 %v479_v34, %v3378_v19  ;;  %v501_v53 = vadd.f32 %v485_v40, %v3381_v20 }
  0xb3   : > { %v457_v30 = vmul.f32 %v3388_v24, %v3388_v24 }
  0xb4   : > { %v448_v31 = vmul.f32 %v3392_v28, %v3392_v28  ;;  %v454_v32 = vmul.f32 %v3395_v29, %v3395_v29  ;;  %v511_v55 = vmul.f32 0.7978846, %v495_v44  ;;  %v517_v1 = vmul.f32 0.7978846, %v501_v53 }
  0xb5   : > { %v473_v37 = vmul.f32 %v457_v30, %v3388_v24 }
  0xb6   : > { %v464_v35 = vmul.f32 %v448_v31, %v3392_v28  ;;  %v470_v36 = vmul.f32 %v454_v32, %v3395_v29  ;;  %3228 = vtanh.f32 %v511_v55 }
  0xb7   : > { %v489_v48 = vmul.f32 0.044715, %v473_v37 }
  0xb8   : > { %v480_v38 = vmul.f32 0.044715, %v464_v35  ;;  %v434_v39 = vpop.f32.mrf.mxu3  ;;  %v486_v45 = vmul.f32 0.044715, %v470_v36 }
  0xb9   : > { %v3408_v41 = vadd.f32 %v3375_v16, %v434_v39  ;;  %v412_v42 = vpop.f32.mrf.mxu0  ;;  %v427_v43 = vpop.f32.mrf.mxu1  ;;  %v505_v59 = vadd.f32 %v489_v48, %v3388_v24 }
  0xba   : > { %v3412_v46 = vadd.f32 %v3375_v16, %v412_v42  ;;  %v3415_v47 = vadd.f32 %v3375_v16, %v427_v43  ;;  %v496_v50 = vadd.f32 %v480_v38, %v3392_v28  ;;  %v502_v56 = vadd.f32 %v486_v45, %v3395_v29 }
  0xbb   : > { %v458_v49 = vmul.f32 %v3408_v41, %v3408_v41  ;;  %v521_v8 = vmul.f32 0.7978846, %v505_v59 }
  0xbc   : > { %v449_v51 = vmul.f32 %v3412_v46, %v3412_v46  ;;  %v455_v52 = vmul.f32 %v3415_v47, %v3415_v47  ;;  %v512_v61 = vmul.f32 0.7978846, %v496_v50  ;;  %v518_v5 = vmul.f32 0.7978846, %v502_v56  ;;  %v3229_v25 = vpop.eup %3228 }
  0xbd   : > { %v474_v54 = vmul.f32 %v458_v49, %v3408_v41 }
  0xbe   : > { %v465_v57 = vmul.f32 %v449_v51, %v3412_v46  ;;  %v471_v58 = vmul.f32 %v455_v52, %v3415_v47  ;;  %3230 = vtanh.f32 %v512_v61  ;;  %v543_v52 = vadd.f32 1.0, %v3229_v25 }
  0xbf   : > { %v490_v60 = vmul.f32 0.044715, %v474_v54  ;;  %3232 = vtanh.f32 %v517_v1 }
  0xc0   : > { %v481_v62 = vmul.f32 0.044715, %v465_v57  ;;  %v487_v63 = vmul.f32 0.044715, %v471_v58  ;;  %v437_v0 = vpop.f32.mrf.mxu3  ;;  %3234 = vtanh.f32 %v518_v5 }
  0xc1   : > { %v3431_v2 = vadd.f32 %v3375_v16, %v437_v0  ;;  %v414_v3 = vpop.f32.mrf.mxu0  ;;  %v429_v4 = vpop.f32.mrf.mxu1  ;;  %v506_v9 = vadd.f32 %v490_v60, %v3408_v41  ;;  %3236 = vtanh.f32 %v521_v8 }
  0xc2   : > { %v497_v6 = vadd.f32 %v481_v62, %v3412_v46  ;;  %v3435_v7 = vadd.f32 %v3375_v16, %v414_v3  ;;  %v3441_v11 = vadd.f32 %v3375_v16, %v429_v4  ;;  %v503_v12 = vadd.f32 %v487_v63, %v3415_v47 }
  0xc3   : > { %v459_v10 = vmul.f32 %v3431_v2, %v3431_v2  ;;  %v522_v21 = vmul.f32 0.7978846, %v506_v9  ;;  %v3287_v3 = vmov 16.0  }
  0xc4   : > { %v450_v13 = vmul.f32 %v3435_v7, %v3435_v7  ;;  %v513_v14 = vmul.f32 0.7978846, %v497_v6  ;;  %v456_v17 = vmul.f32 %v3441_v11, %v3441_v11  ;;  %v519_v26 = vmul.f32 0.7978846, %v503_v12  ;;  %v3231_v35 = vpop.eup %3230 }
  0xc5   : > { %v475_v15 = vmul.f32 %v459_v10, %v3431_v2  ;;  %v3233_v38 = vpop.eup %3232  ;;  %v544_v49 = vadd.f32 1.0, %v3231_v35  ;;  %v559_v10 = vmul.f32 0.5, %v543_v52 }
  0xc6   : > { %v466_v18 = vmul.f32 %v450_v13, %v3435_v7  ;;  %v472_v23 = vmul.f32 %v456_v17, %v3441_v11  ;;  %3238 = vtanh.f32 %v513_v14  ;;  %v3235_v42 = vpop.eup %3234  ;;  %v549_v55 = vadd.f32 1.0, %v3233_v38 }
  0xc7   : > { %v491_v22 = vmul.f32 0.044715, %v475_v15  ;;  %3240 = vtanh.f32 %v522_v21  ;;  %v3237_v48 = vpop.eup %3236  ;;  %v550_v53 = vadd.f32 1.0, %v3235_v42  ;;  %v560_v60 = vmul.f32 0.5, %v544_v49 }
  0xc8   : > { %v482_v27 = vmul.f32 0.044715, %v466_v18  ;;  %v439_v30 = vpop.f32.mrf.mxu3  ;;  %v488_v32 = vmul.f32 0.044715, %v472_v23  ;;  %3242 = vtanh.f32 %v519_v26  ;;  %v553_v56 = vadd.f32 1.0, %v3237_v48 }
  0xc9   : > { %v507_v31 = vadd.f32 %v491_v22, %v3431_v2  ;;  %v3453_v33 = vadd.f32 %v3375_v16, %v439_v30  ;;  %v417_v34 = vpop.f32.mrf.mxu0  ;;  %v566_v4 = vmul.f32 0.5, %v550_v53  ;;  %v565_v12 = vmul.f32 0.5, %v549_v55  ;;  %v3022_v53 = vld [vmem:[%s4547_s2 + $0x74] sm:$0xf] }
  0xca   : > { %v498_v36 = vadd.f32 %v482_v27, %v3435_v7  ;;  %v3457_v37 = vadd.f32 %v3375_v16, %v417_v34  ;;  %v504_v39 = vadd.f32 %v488_v32, %v3441_v11  ;;  %v569_v13 = vmul.f32 0.5, %v553_v56 }
  0xcb   : > { %v460_v40 = vmul.f32 %v3453_v33, %v3453_v33  ;;  %v523_v43 = vmul.f32 0.7978846, %v507_v31  ;;  %v576_v17 = vmul.f32 %v560_v60, %v3392_v28  ;;  %v582_v31 = vmul.f32 %v566_v4, %v3395_v29 }
  0xcc   : > { %v514_v44 = vmul.f32 0.7978846, %v498_v36  ;;  %v451_v45 = vmul.f32 %v3457_v37, %v3457_v37  ;;  %v520_v50 = vmul.f32 0.7978846, %v504_v39  ;;  %v3239_v51 = vpop.eup %3238  ;;  %v575_v35 = vmul.f32 %v559_v10, %v3378_v19  ;;  %v3023_v19 = vld [vmem:[%s4547_s2 + $0x74] sm:$0xf0] }
  0xcd   : > { %v476_v54 = vmul.f32 %v460_v40, %v3453_v33  ;;  %v3241_v59 = vpop.eup %3240  ;;  %v545_v63 = vadd.f32 1.0, %v3239_v51  ;;  %v581_v28 = vmul.f32 %v565_v12, %v3381_v20  ;;  %v585_v36 = vmul.f32 %v569_v13, %v3388_v24  ;;  %v2340_v40 = vld [vmem:[%s4547_s2 + $0x70] sm:$0xf]  ;;  %v3019_v12 = vld [vmem:[%s4547_s2 + $0x54] sm:$0xf0] }
  0xce   : > { %3244 = vtanh.f32 %v514_v44  ;;  %v467_v57 = vmul.f32 %v451_v45, %v3457_v37  ;;  %v3243_v1 = vpop.eup %3242  ;;  %v554_v14 = vadd.f32 1.0, %v3241_v59  ;;  %v591_v20 = vadd.f32 %v576_v17, %v575_v35  ;;  %v2324_v10 = vld [vmem:[%s4547_s2 + $0x50] sm:$0xf]  ;;  %v2316_v35 = vld [vmem:[%s4547_s2 + $0x40] sm:$0xf] }
  0xcf   : > { %3246 = vtanh.f32 %v520_v50  ;;  %v492_v61 = vmul.f32 0.044715, %v476_v54  ;;  %v561_v25 = vmul.f32 0.5, %v545_v63  ;;  %v551_v32 = vadd.f32 1.0, %v3243_v1 }
  0xd0   : > { %3248 = vtanh.f32 %v523_v43  ;;  %v442_v58 = vpop.f32.mrf.mxu3  ;;  %v483_v0 = vmul.f32 0.044715, %v467_v57  ;;  %v570_v38 = vmul.f32 0.5, %v554_v14  ;;  %v3494_v50 = vadd.f32 %v582_v31, %v581_v28  ;;  %v3017_v28 = vld [vmem:[%s4547_s2 + $0x44] sm:$0xf0] }
  0xd1   : > { %v3467_v62 = vadd.f32 %v3375_v16, %v442_v58  ;;  %3250 = vrcp.f32 %v3287_v3  ;;  %v508_v5 = vadd.f32 %v492_v61, %v3453_v33  ;;  %v419_v8 = vpop.f32.mrf.mxu0  ;;  %v577_v24 = vmul.f32 %v561_v25, %v3412_v46  ;;  %v2342_v46 = vld [vmem:[%s4547_s2 + $0x78] sm:$0xf0]  ;;  %v2332_v58 = vld [vmem:[%s4547_s2 + $0x60] sm:$0xf] }
  0xd2   : > { %v499_v27 = vadd.f32 %v483_v0, %v3457_v37  ;;  %v3476_v30 = vadd.f32 %v3375_v16, %v419_v8  ;;  %v567_v51 = vmul.f32 0.5, %v551_v32  ;;  %v586_v54 = vmul.f32 %v570_v38, %v3408_v41  ;;  %v3020_v0 = vld [vmem:[%s4547_s2 + $0x64] sm:$0xf] }
  0xd3   : > { %v461_v6 = vmul.f32 %v3467_v62, %v3467_v62  ;;  %v524_v21 = vmul.f32 0.7978846, %v508_v5  ;;  %v2341_v57 = vor.u32 %v3023_v19, %v2340_v40  ;;  %v2345_v4 = vor.u32 %v3022_v53, %v2342_v46  ;;  %v2334_v5 = vld [vmem:[%s4547_s2 + $0x68] sm:$0xf0] }
  0xd4   : > { %v3245_v9 = vpop.eup %3244  ;;  %v515_v48 = vmul.f32 0.7978846, %v499_v27  ;;  %v452_v49 = vmul.f32 %v3476_v30, %v3476_v30  ;;  %v626_v13 = vadd.f32 %v586_v54, %v585_v36  ;;  %v2325_v31 = vor.u32 %v3019_v12, %v2324_v10  ;;  %v3012_v12 = vld [vmem:[%s4547_s2 + $0x24] sm:$0xf] }
  0xd5   : > { %v3247_v15 = vpop.eup %3246  ;;  %v546_v18 = vadd.f32 1.0, %v3245_v9  ;;  %v477_v22 = vmul.f32 %v461_v6, %v3467_v62  ;;  %3252 = vtanh.f32 %v524_v21  ;;  %803 = vmatpush.bf16.msrb.mxu1 %v2341_v57  ;;  %v592_v6 = vrot.slane %v591_v20, 4  ;;  %816 = vmatpush.bf16.msra.mxu2 %v2345_v4  ;;  %v3014_v57 = vld [vmem:[%s4547_s2 + $0x34] sm:$0xf] }
  0xd6   : > { %v3249_v23 = vpop.eup %3248  ;;  %v552_v26 = vadd.f32 1.0, %v3247_v15  ;;  %v468_v56 = vmul.f32 %v452_v49, %v3476_v30  ;;  %3254 = vtanh.f32 %v515_v48  ;;  %v2337_v21 = vor.u32 %v3020_v0, %v2334_v5 }
  0xd7   : > { %v562_v34 = vmul.f32 0.5, %v546_v18  ;;  %v3485_v42 = vpop.eup %3250  ;;  %v555_v43 = vadd.f32 1.0, %v3249_v23  ;;  %v493_v45 = vmul.f32 0.044715, %v477_v22  ;;  %v3018_v22 = vld [vmem:[%s4547_s2 + $0x54] sm:$0xf]  ;;  %v593_v40 = vadd.f32 %v592_v6, %v591_v20 }
  0xd8   : > { %v444_v39 = vpop.f32.mrf.mxu3  ;;  %v568_v44 = vmul.f32 0.5, %v552_v26  ;;  %v484_v3 = vmul.f32 0.044715, %v468_v56  ;;  %v2326_v23 = vld [vmem:[%s4547_s2 + $0x58] sm:$0xf0]  ;;  %v613_v32 = vrot.slane %v3494_v50, 4  ;;  %vm652_vm0 = vweird.f32 %v3485_v42 }
  0xd9   : > { %v578_v29 = vmul.f32 %v562_v34, %v3435_v7  ;;  %v509_v52 = vadd.f32 %v493_v45, %v3467_v62  ;;  %v3498_v7 = vadd.f32 %v3375_v16, %v444_v39  ;;  %v3021_v16 = vld [vmem:[%s4547_s2 + $0x64] sm:$0xf0]  ;;  %v571_v60 = vmul.f32 0.5, %v555_v43  ;;  %817 = vmatpush.bf16.msra.mxu2 %v2337_v21  ;;  %v3016_v39 = vld [vmem:[%s4547_s2 + $0x44] sm:$0xf] }
  0xda   : > { %v584_v61 = vmul.f32 %v568_v44, %v3441_v11  ;;  %v583_v11 = vmul.f32 %v567_v51, %v3415_v47  ;;  %v2333_v9 = vor.u32 %v3021_v16, %v2332_v58  ;;  %v500_v17 = vadd.f32 %v484_v3, %v3476_v30  ;;  %v2318_v44 = vld [vmem:[%s4547_s2 + $0x48] sm:$0xf0]  ;;  %v3015_v20 = vld [vmem:[%s4547_s2 + $0x34] sm:$0xf0]  ;;  %v2310_v58 = vld [vmem:[%s4547_s2 + $0x38] sm:$0xf0] }
  0xdb   : > { %v598_v55 = vadd.f32 %v578_v29, %v577_v24  ;;  %v3253_v59 = vpop.eup %3252  ;;  %v525_v63 = vmul.f32 0.7978846, %v509_v52  ;;  %v462_v41 = vmul.f32 %v3498_v7, %v3498_v7  ;;  %v587_v25 = vmul.f32 %v571_v60, %v3431_v2  ;;  %v2308_v52 = vld [vmem:[%s4547_s2 + $0x30] sm:$0xf]  ;;  %v3013_v3 = vld [vmem:[%s4547_s2 + $0x24] sm:$0xf0] }
  0xdc   : > { %v556_v1 = vadd.f32 1.0, %v3253_v59  ;;  %v619_v18 = vadd.f32 %v584_v61, %v583_v11  ;;  %v516_v27 = vmul.f32 0.7978846, %v500_v17  ;;  %804 = vmatpush.bf16.msrb.mxu1 %v2333_v9  ;;  %v3255_v36 = vpop.eup %3254  ;;  %v648_v45 = vmul.f32 16.0, %v3485_v42 }
  0xdd   : > { %v478_v8 = vmul.f32 %v462_v41, %v3498_v7  ;;  %v599_v14 = vrot.slane %v598_v55, 4  ;;  %3256 = vtanh.f32 %v525_v63  ;;  %v627_v19 = vrot.slane %v626_v13, 4 }
  0xde   : > { %v572_v15 = vmul.f32 0.5, %v556_v1  ;;  %3258 = vtanh.f32 %v516_v27  ;;  %v620_v43 = vrot.slane %v619_v18, 4  ;;  %v2317_v24 = vor.u32 %v3017_v28, %v2316_v35  ;;  %v2300_v1 = vld [vmem:[%s4547_s2 + $0x20] sm:$0xf] }
  0xdf   : > { %v494_v47 = vmul.f32 0.044715, %v478_v8  ;;  %v600_v38 = vadd.f32 %v599_v14, %v598_v55  ;;  %v547_v51 = vadd.f32 1.0, %v3255_v36  ;;  %v614_v53 = vadd.f32 %v613_v32, %v3494_v50 }
  0xe0   : > { %v588_v26 = vmul.f32 %v572_v15, %v3453_v33  ;;  %v2329_v33 = vor.u32 %v3018_v22, %v2326_v23  ;;  %805 = vmatpush.bf16.msrb.mxu1 %v2325_v31  ;;  %v2321_v54 = vor.u32 %v3016_v39, %v2318_v44  ;;  %v594_v55 = vrot.slane %v593_v40, 2  ;;  %v2284_v44 = vld [vmem:[%s4547_s2] sm:$0xf] }
  0xe1   : > { %v510_v34 = vadd.f32 %v494_v47, %v3498_v7  ;;  %v601_v46 = vrot.slane %v600_v38, 2  ;;  %v621_v56 = vadd.f32 %v620_v43, %v619_v18  ;;  %v649_v59 = vsub.f32 1.0, %v648_v45  ;;  %v3009_v45 = vld [vmem:[%s4547_s2 + $0x4] sm:$0xf0] }
  0xe2   : > { %v633_v2 = vadd.f32 %v588_v26, %v587_v25  ;;  %818 = vmatpush.bf16.msra.mxu2 %v2329_v33  ;;  %v628_v60 = vadd.f32 %v627_v19, %v626_v13  ;;  %v2309_v63 = vor.u32 %v3015_v20, %v2308_v52  ;;  %v563_v41 = vmul.f32 0.5, %v547_v51  ;;  %v2302_v13 = vld [vmem:[%s4547_s2 + $0x28] sm:$0xf0]  ;;  %v2292_v25 = vld [vmem:[%s4547_s2 + $0x10] sm:$0xf] }
  0xe3   : > { %v526_v29 = vmul.f32 0.7978846, %v510_v34  ;;  %v3257_v48 = vpop.eup %3256  ;;  %v615_v4 = vrot.slane %v614_v53, 2  ;;  %v602_v5 = vadd.f32 %v601_v46, %v600_v38  ;;  %v2313_v6 = vor.u32 %v3014_v57, %v2310_v58  ;;  %v3011_v26 = vld [vmem:[%s4547_s2 + $0x14] sm:$0xf0] }
  0xe4   : > { %v634_v49 = vrot.slane %v633_v2, 4  ;;  %v3259_v16 = vpop.eup %3258  ;;  %v557_v61 = vadd.f32 1.0, %v3257_v48  ;;  %806 = vmatpush.bf16.msrb.mxu1 %v2317_v24  ;;  %v595_v8 = vadd.f32 %v594_v55, %v593_v40  ;;  %v622_v9 = vrot.slane %v621_v56, 2  ;;  %v3008_v51 = vld [vmem:[%s4547_s2 + $0x4] sm:$0xf] }
  0xe5   : > { %3260 = vtanh.f32 %v526_v29  ;;  %v548_v0 = vadd.f32 1.0, %v3259_v16  ;;  %v629_v14 = vrot.slane %v628_v60, 2  ;;  %v2301_v18 = vor.u32 %v3013_v3, %v2300_v1  ;;  %v2286_v52 = vld [vmem:[%s4547_s2 + $0x8] sm:$0xf0] }
  0xe6   : > { %v635_v50 = vadd.f32 %v634_v49, %v633_v2  ;;  %819 = vmatpush.bf16.msra.mxu2 %v2321_v54  ;;  %v573_v15 = vmul.f32 0.5, %v557_v61  ;;  %v650_v47 = vmul.f32 %v3485_v42, %v649_v59  ;;  %v579_v22 = vmul.f32 %v563_v41, %v3457_v37  ;;  %v3010_v37 = vld [vmem:[%s4547_s2 + $0x14] sm:$0xf] }
  0xe7   : > { %v564_v10 = vmul.f32 0.5, %v548_v0  ;;  %v616_v27 = vadd.f32 %v615_v4, %v614_v53  ;;  %v603_v31 = vrot.slane %v602_v5, 1  ;;  %v2305_v34 = vor.u32 %v3012_v12, %v2302_v13 }
  0xe8   : > { %807 = vmatpush.bf16.msrb.mxu1 %v2309_v63  ;;  %v636_v21 = vrot.slane %v635_v50, 2  ;;  %v596_v35 = vrot.slane %v595_v8, 1  ;;  %v623_v28 = vadd.f32 %v622_v9, %v621_v56  ;;  %v630_v38 = vadd.f32 %v629_v14, %v628_v60 }
  0xe9   : > { %v580_v23 = vmul.f32 %v564_v10, %v3476_v30  ;;  %v2294_v30 = vld [vmem:[%s4547_s2 + $0x18] sm:$0xf0]  ;;  %v589_v2 = vmul.f32 %v573_v15, %v3467_v62  ;;  %v2293_v39 = vor.u32 %v3011_v26, %v2292_v25  ;;  %v651_v40 = vadd.f32 %v3485_v42, %v650_v47 }
  0xea   : > { %820 = vmatpush.bf16.msra.mxu2 %v2313_v6  ;;  %v637_v43 = vadd.f32 %v636_v21, %v635_v50  ;;  %v617_v19 = vrot.slane %v616_v27, 1  ;;  %v604_v62 = vadd.f32 %v603_v31, %v602_v5  ;;  %v624_v48 = vrot.slane %v623_v28, 1 }
  0xeb   : > { %v3261_v11 = vpop.eup %3260  ;;  %v605_v36 = vadd.f32 %v580_v23, %v579_v22  ;;  %v597_v20 = vadd.f32 %v596_v35, %v595_v8  ;;  %v631_v53 = vrot.slane %v630_v38, 1  ;;  %v2285_v54 = vor.u32 %v3009_v45, %v2284_v44 }
  0xec   : > { %v558_v17 = vadd.f32 1.0, %v3261_v11  ;;  %808 = vmatpush.bf16.msrb.mxu1 %v2301_v18  ;;  %v653_v55 = vsel %vm652_vm0, %v3485_v42, %v651_v40  ;;  %v638_v57 = vrot.slane %v637_v43, 1  ;;  %v618_v58 = vadd.f32 %v617_v19, %v616_v27 }
  0xed   : > { %v606_v29 = vrot.slane %v605_v36, 4  ;;  %v655_v16 = vmul.f32 %v653_v55, %v604_v62  ;;  %v2289_v60 = vor.u32 %v3008_v51, %v2286_v52  ;;  %v625_v61 = vadd.f32 %v624_v48, %v623_v28  ;;  %v3120_v51 = vld [vmem:[%s4548_s3 + $0x2ec] sm:$0xf0] (%p839_p5)  ;;  %v2591_v52 = vld [vmem:[%s4548_s3 + $0x3e0] sm:$0xf] (%p839_p5) }
  0xee   : > { %v574_v32 = vmul.f32 0.5, %v558_v17  ;;  %821 = vmatpush.bf16.msra.mxu2 %v2305_v34  ;;  %v654_v50 = vmul.f32 %v653_v55, %v597_v20  ;;  %v632_v0 = vadd.f32 %v631_v53, %v630_v38  ;;  %v639_v3 = vadd.f32 %v638_v57, %v637_v43  ;;  %v266_v43 = vld [vmem:[%s4550_s5 + $0x1] sm:$0x3]  ;;  %v3152_v53 = vld [vmem:[%s4548_s3 + $0x3ec] sm:$0xf0] (%p839_p5) }
  0xef   : > { %v607_v49 = vadd.f32 %v606_v29, %v605_v36  ;;  %v657_v4 = vmul.f32 %v653_v55, %v618_v58  ;;  %v663_v5 = vpack.c.bf16 %v655_v16, %v655_v16  ;;  %v658_v11 = vmul.f32 %v653_v55, %v625_v61  ;;  %v3150_v57 = vld [vmem:[%s4548_s3 + $0x3e4] sm:$0xf] (%p839_p5)  ;;  %v2593_v58 = vld [vmem:[%s4548_s3 + $0x3f0] sm:$0xf0] (%p839_p5)  ;;  %v2447_v16 = vld [vmem:[%s4548_s3 + $0x2c0] sm:$0xf] (%p839_p5) }
  0xf0   : > { %v590_v33 = vmul.f32 %v574_v32, %v3498_v7  ;;  %v2297_v7 = vor.u32 %v3010_v37, %v2294_v30  ;;  %809 = vmatpush.bf16.msrb.mxu1 %v2293_v39  ;;  %v662_v8 = vpack.c.bf16 %v654_v50, %v654_v50  ;;  %v659_v10 = vmul.f32 %v653_v55, %v632_v0  ;;  %v2575_v61 = vld [vmem:[%s4548_s3 + $0x3c0] sm:$0xf] (%p839_p5)  ;;  %v3114_v0 = vld [vmem:[%s4548_s3 + $0x2c4] sm:$0xf] (%p839_p5) }
  0xf1   : > { %v608_v56 = vrot.slane %v607_v49, 2  ;;  %v660_v13 = vmul.f32 %v653_v55, %v639_v3  ;;  %v700_v14 = vunpack.c.l.b16 %v663_v5  ;;  %v665_v17 = vpack.c.bf16 %v657_v4, %v657_v4  ;;  %v3146_v3 = vld [vmem:[%s4548_s3 + $0x3c4] sm:$0xf] (%p839_p5)  ;;  %v2577_v5 = vld [vmem:[%s4548_s3 + $0x3d0] sm:$0xf0] (%p839_p5) }
  0xf2   : > { %v640_v24 = vadd.f32 %v590_v33, %v589_v2  ;;  %822 = vmatpush.bf16.msra.mxu2 %v2297_v7  ;;  %v666_v47 = vpack.c.bf16 %v658_v11, %v658_v11  ;;  %v699_v21 = vunpack.c.l.b16 %v662_v8  ;;  %v667_v23 = vpack.c.bf16 %v659_v10, %v659_v10  ;;  %v2559_v8 = vld [vmem:[%s4548_s3 + $0x3a0] sm:$0xf] (%p839_p5)  ;;  %v3110_v10 = vld [vmem:[%s4548_s3 + $0x2a4] sm:$0xf] (%p839_p5) }
  0xf3   : > { %v609_v63 = vadd.f32 %v608_v56, %v607_v49  ;;  %v668_v26 = vpack.c.bf16 %v660_v13, %v660_v13  ;;  %v702_v31 = vunpack.c.l.b16 %v665_v17  ;;  %v687_v29 = vperm.slane %v266_v43, 0  ;;  %v2463_v49 = vld [vmem:[%s4548_s3 + $0x2e0] sm:$0xf] (%p839_p5)  ;;  %v2433_v13 = vld [vmem:[%s4548_s3 + $0x2b0] sm:$0xf0] (%p839_p5) }
  0xf4   : > { %v641_v46 = vrot.slane %v640_v24, 4  ;;  %810 = vmatpush.bf16.msrb.mxu1 %v2285_v54  ;;  %v708_v32 = vsel %vm707_vm1, %v700_v14, %v699_v21  ;;  %v703_v34 = vunpack.c.l.b16 %v666_v47  ;;  %v704_v28 = vunpack.c.l.b16 %v667_v23  ;;  %v2465_v54 = vld [vmem:[%s4548_s3 + $0x2f0] sm:$0xf0] (%p839_p5)  ;;  %v3142_v14 = vld [vmem:[%s4548_s3 + $0x3a4] sm:$0xf] (%p839_p5) }
  0xf5   : > { %v610_v1 = vrot.slane %v609_v63, 1  ;;  %v705_v30 = vunpack.c.l.b16 %v668_v26  ;;  %v688_v19 = vperm.slane %v266_v43, 1  ;;  %v2464_v20 = vor.u32 (%p839_p5), %v3120_v51, %v2463_v49  ;;  %v2415_v47 = vld [vmem:[%s4548_s3 + $0x280] sm:$0xf] (%p839_p5)  ;;  %v3108_v21 = vld [vmem:[%s4548_s3 + $0x28c] sm:$0xf0] (%p839_p5) }
  0xf6   : > { %v642_v59 = vadd.f32 %v641_v46, %v640_v24  ;;  %823 = vmatpush.bf16.msra.mxu2 %v2289_v60  ;;  %v3118_v46 = vld [vmem:[%s4548_s3 + $0x2e4] sm:$0xf] (%p839_p5)  ;;  %v3116_v60 = vld [vmem:[%s4548_s3 + $0x2cc] sm:$0xf0] (%p839_p5)  ;;  %v2580_v11 = vor.u32 (%p839_p5), %v3146_v3, %v2577_v5  ;;  %v2529_v43 = vld [vmem:[%s4548_s3 + $0x370] sm:$0xf0] (%p839_p5) }
  0xf7   : > { %v611_v42 = vadd.f32 %v610_v1, %v609_v63  ;;  %v2468_v56 = vor.u32 (%p839_p5), %v3118_v46, %v2465_v54  ;;  %1304 = vmatpush.bf16.msra.mxu0 (%p839_p5), %v2464_v20  ;;  %v3148_v63 = vld [vmem:[%s4548_s3 + $0x3cc] sm:$0xf0] (%p839_p5)  ;;  %v2448_v50 = vor.u32 (%p839_p5), %v3116_v60, %v2447_v16  ;;  %v2449_v1 = vld [vmem:[%s4548_s3 + $0x2d0] sm:$0xf0] (%p839_p5)  ;;  %v3106_v26 = vld [vmem:[%s4548_s3 + $0x284] sm:$0xf] (%p839_p5) }
  0xf8   : > { %v643_v41 = vrot.slane %v642_v59, 2  ;;  %v2452_v4 = vor.u32 (%p839_p5), %v3114_v0, %v2449_v1  ;;  %v3098_v49 = vld [vmem:[%s4548_s3 + $0x244] sm:$0xf] (%p839_p5)  ;;  %v2385_v51 = vld [vmem:[%s4548_s3 + $0x250] sm:$0xf0] (%p839_p5) }
  0xf9   : > { %v656_v12 = vmul.f32 %v653_v55, %v611_v42  ;;  %v3112_v42 = vld [vmem:[%s4548_s3 + $0x2ac] sm:$0xf0] (%p839_p5)  ;;  %v2513_v20 = vld [vmem:[%s4548_s3 + $0x350] sm:$0xf0] (%p839_p5)  ;;  %v2388_v54 = vor.u32 (%p839_p5), %v3098_v49, %v2385_v51 }
  0xfa   : > { %v644_v6 = vadd.f32 %v643_v41, %v642_v59  ;;  %v2596_v59 = vor.u32 (%p839_p5), %v3150_v57, %v2593_v58  ;;  %v2576_v41 = vor.u32 (%p839_p5), %v3148_v63, %v2575_v61  ;;  %v2495_v57 = vld [vmem:[%s4548_s3 + $0x320] sm:$0xf] (%p839_p5)  ;;  %v3128_v16 = vld [vmem:[%s4548_s3 + $0x32c] sm:$0xf0] (%p839_p5)  ;;  %v2369_v60 = vld [vmem:[%s4548_s3 + $0x230] sm:$0xf0] (%p839_p5) }
  0xfb   : > { %v664_v18 = vpack.c.bf16 %v656_v12, %v656_v12  ;;  %1305 = vmatpush.bf16.msra.mxu0 (%p839_p5), %v2448_v50  ;;  %v3126_v61 = vld [vmem:[%s4548_s3 + $0x324] sm:$0xf] (%p839_p5)  ;;  %v2497_v63 = vld [vmem:[%s4548_s3 + $0x330] sm:$0xf0] (%p839_p5)  ;;  %v3092_v0 = vld [vmem:[%s4548_s3 + $0x20c] sm:$0xf0] (%p839_p5)  ;;  %v2496_v1 = vor.u32 (%p839_p5), %v3128_v16, %v2495_v57 }
  0xfc   : > { %v645_v9 = vrot.slane %v644_v6, 1  ;;  %1343 = vmatpush.bf16.msra.mxu3 (%p839_p5), %v2596_v59  ;;  %v3094_v59 = vld [vmem:[%s4548_s3 + $0x224] sm:$0xf] (%p839_p5)  ;;  %v3124_v5 = vld [vmem:[%s4548_s3 + $0x30c] sm:$0xf0] (%p839_p5) }
  0xfd   : > { %v701_v25 = vunpack.c.l.b16 %v664_v18  ;;  %v2436_v18 = vor.u32 (%p839_p5), %v3110_v10, %v2433_v13  ;;  %v2372_v3 = vor.u32 (%p839_p5), %v3094_v59, %v2369_v60  ;;  %v2471_v10 = vld [vmem:[%s4548_s3 + $0x2e8] sm:$0xf] (%p839_p5)  ;;  %v3141_v16 = vld [vmem:[%s4548_s3 + $0x394] sm:$0xf0] (%p839_p5)  ;;  %v3107_v59 = vld [vmem:[%s4548_s3 + $0x28c] sm:$0xf] (%p839_p5) }
  0xfe   : > { %v646_v15 = vadd.f32 %v645_v9, %v644_v6  ;;  %v2431_v6 = vld [vmem:[%s4548_s3 + $0x2a0] sm:$0xf] (%p839_p5)  ;;  %v3144_v9 = vld [vmem:[%s4548_s3 + $0x3ac] sm:$0xf0] (%p839_p5)  ;;  %v2599_v13 = vld [vmem:[%s4548_s3 + $0x3e8] sm:$0xf] (%p839_p5) }
  0xff   : > { %v710_v35 = vsel %vm709_vm2, %v701_v25, %v708_v32  ;;  %v2432_v12 = vor.u32 (%p839_p5), %v3112_v42, %v2431_v6  ;;  %v2560_v17 = vor.u32 (%p839_p5), %v3144_v9, %v2559_v8  ;;  %v3140_v25 = vld [vmem:[%s4548_s3 + $0x38c] sm:$0xf0] (%p839_p5)  ;;  %v2545_v32 = vld [vmem:[%s4548_s3 + $0x390] sm:$0xf0] (%p839_p5)  ;;  %v3090_v6 = vld [vmem:[%s4548_s3 + $0x204] sm:$0xf] (%p839_p5)  ;;  %v2500_v42 = vor.u32 (%p839_p5), %v3126_v61, %v2497_v63 }
 0x100   : > { %v661_v22 = vmul.f32 %v653_v55, %v646_v15  ;;  %v712_v37 = vsel %vm711_vm3, %v702_v31, %v710_v35  ;;  %v2592_v55 = vor.u32 (%p839_p5), %v3152_v53, %v2591_v52  ;;  %v2561_v15 = vld [vmem:[%s4548_s3 + $0x3b0] sm:$0xf0] (%p839_p5)  ;;  %1344 = vmatpush.bf16.msra.mxu3 (%p839_p5), %v2580_v11  ;;  %v3138_v31 = vld [vmem:[%s4548_s3 + $0x384] sm:$0xf] (%p839_p5)  ;;  %v2425_v60 = vld [vmem:[%s4548_s3 + $0x298] sm:$0xf0] (%p839_p5) }
 0x101   : > { %v714_v38 = vsel %vm713_vm4, %v703_v34, %v712_v37  ;;  %v2564_v23 = vor.u32 (%p839_p5), %v3142_v14, %v2561_v15  ;;  %1306 = vmatpush.bf16.msra.mxu0 (%p839_p5), %v2432_v12  ;;  %v2416_v34 = vor.u32 (%p839_p5), %v3108_v21, %v2415_v47  ;;  %v3104_v37 = vld [vmem:[%s4548_s3 + $0x26c] sm:$0xf0] (%p839_p5)  ;;  %v3130_v52 = vld [vmem:[%s4548_s3 + $0x344] sm:$0xf] (%p839_p5)  ;;  %v2353_v11 = vld [vmem:[%s4548_s3 + $0x210] sm:$0xf0] (%p839_p5) }
 0x102   : > { %v669_v27 = vpack.c.bf16 %v661_v22, %v661_v22  ;;  %v716_v2 = vsel %vm715_vm5, %v704_v28, %v714_v38  ;;  %1317 = vmatpush.bf16.msra.mxu1 (%p839_p5), %v2592_v55  ;;  %v2543_v22 = vld [vmem:[%s4548_s3 + $0x380] sm:$0xf] (%p839_p5)  ;;  %v2548_v38 = vor.u32 (%p839_p5), %v3138_v31, %v2545_v32  ;;  %v2516_v58 = vor.u32 (%p839_p5), %v3130_v52, %v2513_v20  ;;  %v3122_v8 = vld [vmem:[%s4548_s3 + $0x304] sm:$0xf] (%p839_p5)  ;;  %v2481_v9 = vld [vmem:[%s4548_s3 + $0x310] sm:$0xf0] (%p839_p5) }
 0x103   : > { %v718_v33 = vsel %vm717_vm6, %v705_v30, %v716_v2  ;;  %v2544_v35 = vor.u32 (%p839_p5), %v3140_v25, %v2543_v22  ;;  %v2527_v30 = vld [vmem:[%s4548_s3 + $0x360] sm:$0xf] (%p839_p5)  ;;  %v3136_v2 = vld [vmem:[%s4548_s3 + $0x36c] sm:$0xf0] (%p839_p5)  ;;  %v3121_v12 = vld [vmem:[%s4548_s3 + $0x2f4] sm:$0xf0] (%p839_p5)  ;;  %v2356_v21 = vor.u32 (%p839_p5), %v3090_v6, %v2353_v11  ;;  %v2484_v25 = vor.u32 (%p839_p5), %v3122_v8, %v2481_v9 }
 0x104   : > { %v706_v36 = vunpack.c.l.b16 %v669_v27  ;;  %v2417_v27 = vld [vmem:[%s4548_s3 + $0x290] sm:$0xf0] (%p839_p5)  ;;  %1345 = vmatpush.bf16.msra.mxu3 (%p839_p5), %v2564_v23  ;;  %v2367_v55 = vld [vmem:[%s4548_s3 + $0x220] sm:$0xf] (%p839_p5)  ;;  %v3153_v15 = vld [vmem:[%s4548_s3 + $0x3f4] sm:$0xf0] (%p839_p5) }
 0x105   : > { %v2420_v28 = vor.u32 (%p839_p5), %v3106_v26, %v2417_v27  ;;  %1307 = vmatpush.bf16.msra.mxu0 (%p839_p5), %v2416_v34  ;;  %v3151_v22 = vld [vmem:[%s4548_s3 + $0x3ec] sm:$0xf] (%p839_p5)  ;;  %v2601_v23 = vld [vmem:[%s4548_s3 + $0x3f8] sm:$0xf0] (%p839_p5)  ;;  %v2472_v26 = vor.u32 (%p839_p5), %v3121_v12, %v2471_v10  ;;  %v2600_v27 = vor.u32 (%p839_p5), %v3153_v15, %v2599_v13  ;;  %v2455_v32 = vld [vmem:[%s4548_s3 + $0x2c8] sm:$0xf] (%p839_p5) }
 0x106   : > { %v720_v39 = vsel %vm719_vm7, %v706_v36, %v718_v33  ;;  %1318 = vmatpush.bf16.msra.mxu1 (%p839_p5), %v2576_v41  ;;  %v2399_v36 = vld [vmem:[%s4548_s3 + $0x260] sm:$0xf] (%p839_p5)  ;;  %v3102_v33 = vld [vmem:[%s4548_s3 + $0x264] sm:$0xf] (%p839_p5)  ;;  %v3117_v34 = vld [vmem:[%s4548_s3 + $0x2d4] sm:$0xf0] (%p839_p5) }
 0x107   : > { %v721_v40 = vpack.c.b16 %v720_v39, %v720_v39  ;;  %v2401_v39 = vld [vmem:[%s4548_s3 + $0x270] sm:$0xf0] (%p839_p5)  ;;  %v2351_v41 = vld [vmem:[%s4548_s3 + $0x200] sm:$0xf] (%p839_p5)  ;;  %v3139_v61 = vld [vmem:[%s4548_s3 + $0x38c] sm:$0xf] (%p839_p5) }
 0x108   : > { %1346 = vmatpush.bf16.msra.mxu3 (%p839_p5), %v2548_v38  ;;  %v2352_v14 = vor.u32 (%p839_p5), %v3092_v0, %v2351_v41  ;;  %v3147_v38 = vld [vmem:[%s4548_s3 + $0x3cc] sm:$0xf] (%p839_p5)  ;;  %v2553_v63 = vld [vmem:[%s4548_s3 + $0x398] sm:$0xf0] (%p839_p5)  ;;  %v2428_v0 = vor.u32 (%p839_p5), %v3107_v59, %v2425_v60  ;;  %v3137_v6 = vld [vmem:[%s4548_s3 + $0x374] sm:$0xf0] (%p839_p5) }
 0x109   : > { %811 = vmatmul.bf16.vlgmr.msrb.gmra.mxu1 %v721_v40  ;;  %824 = vmatmul.bf16.vlgmr.msra.gmra.mxu2 %v721_v40  ;;  %v3134_v40 = vld [vmem:[%s4548_s3 + $0x364] sm:$0xf] (%p839_p5)  ;;  %v2409_v11 = vld [vmem:[%s4548_s3 + $0x278] sm:$0xf0] (%p839_p5)  ;;  %v3135_v8 = vld [vmem:[%s4548_s3 + $0x36c] sm:$0xf] (%p839_p5) }
 0x10a   : > { %1330 = vmatpush.bf16.msra.mxu2 (%p839_p5), %v2468_v56  ;;  %1319 = vmatpush.bf16.msra.mxu1 (%p839_p5), %v2560_v17  ;;  %v3096_v56 = vld [vmem:[%s4548_s3 + $0x22c] sm:$0xf0] (%p839_p5)  ;;  %v3119_v17 = vld [vmem:[%s4548_s3 + $0x2ec] sm:$0xf] (%p839_p5)  ;;  %v2537_v9 = vld [vmem:[%s4548_s3 + $0x378] sm:$0xf0] (%p839_p5) }
 0x10b   : > { %v2368_v50 = vor.u32 (%p839_p5), %v3096_v56, %v2367_v55  ;;  %v2551_v55 = vld [vmem:[%s4548_s3 + $0x388] sm:$0xf] (%p839_p5)  ;;  %v3101_v15 = vld [vmem:[%s4548_s3 + $0x254] sm:$0xf0] (%p839_p5)  ;;  %v2849_v59 = vld [vmem:[%s4548_s3 + $0x1f0] sm:$0xf0] (%p839_p5) }
 0x10c   : > { %v2552_v41 = vor.u32 (%p839_p5), %v3141_v16, %v2551_v55  ;;  %v3086_v16 = vld [vmem:[%s4548_s3 + $0x1e4] sm:$0xf] (%p839_p5) }
 0x10e   : > { %1331 = vmatpush.bf16.msra.mxu2 (%p839_p5), %v2452_v4  ;;  %1320 = vmatpush.bf16.msra.mxu1 (%p839_p5), %v2544_v35  ;;  %v2479_v4 = vld [vmem:[%s4548_s3 + $0x300] sm:$0xf] (%p839_p5)  ;;  %v2583_v35 = vld [vmem:[%s4548_s3 + $0x3c8] sm:$0xf] (%p839_p5) }
 0x10f   : > { %v2480_v47 = vor.u32 (%p839_p5), %v3124_v5, %v2479_v4  ;;  %v2535_v4 = vld [vmem:[%s4548_s3 + $0x368] sm:$0xf] (%p839_p5)  ;;  %v2556_v5 = vor.u32 (%p839_p5), %v3139_v61, %v2553_v63 }
 0x110   : > { %v2536_v12 = vor.u32 (%p839_p5), %v3137_v6, %v2535_v4  ;;  %v3084_v4 = vld [vmem:[%s4548_s3 + $0x1cc] sm:$0xf0] (%p839_p5)  ;;  %v2705_v6 = vld [vmem:[%s4548_s3 + $0xd0] sm:$0xf0] (%p839_p5) }
 0x112   : > { %1332 = vmatpush.bf16.msra.mxu2 (%p839_p5), %v2436_v18  ;;  %v2473_v18 = vld [vmem:[%s4548_s3 + $0x2f8] sm:$0xf0] (%p839_p5) }
 0x113   : > { %v2476_v31 = vor.u32 (%p839_p5), %v3119_v17, %v2473_v18  ;;  %v2519_v17 = vld [vmem:[%s4548_s3 + $0x348] sm:$0xf] (%p839_p5)  ;;  %v2540_v18 = vor.u32 (%p839_p5), %v3135_v8, %v2537_v9 }
 0x116   : > { %1333 = vmatpush.bf16.msra.mxu2 (%p839_p5), %v2420_v28  ;;  %v2604_v28 = vor.u32 (%p839_p5), %v3151_v22, %v2601_v23  ;;  %v2393_v22 = vld [vmem:[%s4548_s3 + $0x258] sm:$0xf0] (%p839_p5)  ;;  %v3131_v23 = vld [vmem:[%s4548_s3 + $0x34c] sm:$0xf] (%p839_p5) }
 0x186   : > { %v812_v44 = vpop.f32.mrf.mxu1 }
 0x187   : > { %v813_v45 = vadd.f32 %v812_v44, %v687_v29  ;;  %v2400_v29 = vor.u32 (%p839_p5), %v3104_v37, %v2399_v36  ;;  %v2528_v44 = vor.u32 (%p839_p5), %v3136_v2, %v2527_v30  ;;  %v3149_v36 = vld [vmem:[%s4548_s3 + $0x3d4] sm:$0xf0] (%p839_p5)  ;;  %v3115_v37 = vld [vmem:[%s4548_s3 + $0x2cc] sm:$0xf] (%p839_p5)  ;;  %v2457_v30 = vld [vmem:[%s4548_s3 + $0x2d8] sm:$0xf0] (%p839_p5) }
 0x188   : > { %v2585_v2 = vld [vmem:[%s4548_s3 + $0x3d8] sm:$0xf0] (%p839_p5) }
 0x189   : > { %837 = vst [vmem:[%s836_s11] sm:$0xff] %v813_v45  ;;  %v2404_v45 = vor.u32 (%p839_p5), %v3102_v33, %v2401_v39  ;;  %1308 = vmatpush.bf16.msra.mxu0 (%p839_p5), %v2400_v29  ;;  %1321 = vmatpush.bf16.msra.mxu1 (%p839_p5), %v2528_v44  ;;  %v2456_v33 = vor.u32 (%p839_p5), %v3117_v34, %v2455_v32  ;;  %v2439_v39 = vld [vmem:[%s4548_s3 + $0x2a8] sm:$0xf] (%p839_p5)  ;;  %v3113_v29 = vld [vmem:[%s4548_s3 + $0x2b4] sm:$0xf0] (%p839_p5) }
 0x18a   : > { %v2567_v44 = vld [vmem:[%s4548_s3 + $0x3a8] sm:$0xf] (%p839_p5)  ;;  %v2440_v49 = vor.u32 (%p839_p5), %v3113_v29, %v2439_v39  ;;  %v3097_v34 = vld [vmem:[%s4548_s3 + $0x234] sm:$0xf0] (%p839_p5) }
 0x18b   : > { %1334 = vmatpush.bf16.msra.mxu2 (%p839_p5), %v2404_v45  ;;  %v3145_v45 = vld [vmem:[%s4548_s3 + $0x3b4] sm:$0xf0] (%p839_p5)  ;;  %v2375_v32 = vld [vmem:[%s4548_s3 + $0x228] sm:$0xf] (%p839_p5) }
 0x18c   : > { %v825_v62 = vpop.f32.mrf.mxu2  ;;  %v2568_v51 = vor.u32 (%p839_p5), %v3145_v45, %v2567_v44  ;;  %v2359_v39 = vld [vmem:[%s4548_s3 + $0x208] sm:$0xf] (%p839_p5)  ;;  %v3125_v45 = vld [vmem:[%s4548_s3 + $0x314] sm:$0xf0] (%p839_p5) }
 0x18d   : > { %v826_v24 = vadd.f32 %v825_v62, %v688_v19  ;;  %v2383_v19 = vld [vmem:[%s4548_s3 + $0x240] sm:$0xf] (%p839_p5)  ;;  %v3100_v62 = vld [vmem:[%s4548_s3 + $0x24c] sm:$0xf0] (%p839_p5)  ;;  %v2487_v44 = vld [vmem:[%s4548_s3 + $0x308] sm:$0xf] (%p839_p5) }
 0x18e   : > { %v814_v7 = vpop.f32.mrf.mxu1  ;;  %v2384_v53 = vor.u32 (%p839_p5), %v3100_v62, %v2383_v19  ;;  %v2588_v19 = vor.u32 (%p839_p5), %v3147_v38, %v2585_v2  ;;  %v3111_v62 = vld [vmem:[%s4548_s3 + $0x2ac] sm:$0xf] (%p839_p5)  ;;  %v2505_v2 = vld [vmem:[%s4548_s3 + $0x338] sm:$0xf0] (%p839_p5)  ;;  %v2488_v55 = vor.u32 (%p839_p5), %v3125_v45, %v2487_v44  ;;  %v2657_v44 = vld [vmem:[%s4548_s3 + $0x70] sm:$0xf0] (%p839_p5) }
 0x18f   : > { %838 = vst [vmem:[%s836_s11 + $0x8] sm:$0xff] %v826_v24  ;;  %v2511_v24 = vld [vmem:[%s4548_s3 + $0x340] sm:$0xf] (%p839_p5)  ;;  %v2532_v7 = vor.u32 (%p839_p5), %v3134_v40, %v2529_v43  ;;  %1335 = vmatpush.bf16.msra.mxu2 (%p839_p5), %v2388_v54  ;;  %v2584_v40 = vor.u32 (%p839_p5), %v3149_v36, %v2583_v35  ;;  %v2460_v43 = vor.u32 (%p839_p5), %v3115_v37, %v2457_v30  ;;  %v3109_v54 = vld [vmem:[%s4548_s3 + $0x294] sm:$0xf0] (%p839_p5) }
 0x190   : > { %844 = sbr.rel (!%p839_p5) target bundleno = 792 (0x318), region = 48  ;;  %1309 = vmatpush.bf16.msra.mxu0 (%p839_p5), %v2384_v53  ;;  %v2503_v35 = vld [vmem:[%s4548_s3 + $0x328] sm:$0xf] (%p839_p5)  ;;  %v3129_v36 = vld [vmem:[%s4548_s3 + $0x334] sm:$0xf0] (%p839_p5) }
 0x191   : > { %1347 = vmatpush.bf16.msra.mxu3 (%p839_p5), %v2532_v7  ;;  %v3143_v7 = vld [vmem:[%s4548_s3 + $0x3ac] sm:$0xf] (%p839_p5)  ;;  %v2377_v30 = vld [vmem:[%s4548_s3 + $0x238] sm:$0xf0] (%p839_p5)  ;;  %v3070_v45 = vld [vmem:[%s4548_s3 + $0x164] sm:$0xf] (%p839_p5) }
 0x192   : > { %v3095_v37 = vld [vmem:[%s4548_s3 + $0x22c] sm:$0xf] (%p839_p5) }
 0x193   : > { %1336 = vmatpush.bf16.msra.mxu2 (%p839_p5), %v2372_v3  ;;  %v3105_v3 = vld [vmem:[%s4548_s3 + $0x274] sm:$0xf0] (%p839_p5)  ;;  %v3127_v38 = vld [vmem:[%s4548_s3 + $0x32c] sm:$0xf] (%p839_p5)  ;;  %v2380_v29 = vor.u32 (%p839_p5), %v3095_v37, %v2377_v30 }
 0x194   : > { %v827_v48 = vpop.f32.mrf.mxu2  ;;  %1310 = vmatpush.bf16.msra.mxu0 (%p839_p5), %v2368_v50 }
 0x195   : > { %v3132_v48 = vld [vmem:[%s4548_s3 + $0x34c] sm:$0xf0]  ;;  %1348 = vmatpush.bf16.msra.mxu3 %v2516_v58 }
 0x196   : > { %v2512_v46 = vor.u32 %v3132_v48, %v2511_v24  ;;  %v2441_v24 = vld [vmem:[%s4548_s3 + $0x2b8] sm:$0xf0]  ;;  %v852_v52 = vld [vmem:[#allocation2 + $0x10] sm:$0xff] }
 0x197   : > { %1337 = vmatpush.bf16.msra.mxu2 %v2356_v21  ;;  %v2569_v48 = vld [vmem:[%s4548_s3 + $0x3b8] sm:$0xf0]  ;;  %v2444_v53 = vor.u32 %v3111_v62, %v2441_v24  ;;  %v3894_v56 = vpack.c.bf16 %v852_v52, %v852_v52  ;;  %v3099_v21 = vld [vmem:[%s4548_s3 + $0x24c] sm:$0xf]  ;;  %v2508_v62 = vor.u32 %v3127_v38, %v2505_v2  ;;  %v2847_v52 = vld [vmem:[%s4548_s3 + $0x1e0] sm:$0xf] }
 0x198   : > { %1322 = vmatpush.bf16.msra.mxu1 %v2512_v46  ;;  %1311 = vmatpush.bf16.msra.mxu0 %v2352_v14  ;;  %v853_v20 = vld [vmem:[#allocation2 + $0x18] sm:$0xff]  ;;  %v2423_v46 = vld [vmem:[%s4548_s3 + $0x288] sm:$0xf]  ;;  %v2572_v58 = vor.u32 %v3143_v7, %v2569_v48  ;;  %v3123_v7 = vld [vmem:[%s4548_s3 + $0x30c] sm:$0xf] }
 0x199   : > { %1349 = vmatpush.bf16.msra.mxu3 %v2500_v42  ;;  %v3896_v57 = vpack.c.bf16 %v853_v20, %v853_v20  ;;  %v2424_v50 = vor.u32 %v3109_v54, %v2423_v46  ;;  %v3103_v42 = vld [vmem:[%s4548_s3 + $0x26c] sm:$0xf]  ;;  %v2391_v14 = vld [vmem:[%s4548_s3 + $0x248] sm:$0xf]  ;;  %v2361_v24 = vld [vmem:[%s4548_s3 + $0x218] sm:$0xf0] }
 0x19a   : > { %1338 = vmatmul.bf16.vlgmr.msra.gmra.mxu2 %v3894_v56  ;;  %v2412_v13 = vor.u32 %v3103_v42, %v2409_v11  ;;  %v2489_v48 = vld [vmem:[%s4548_s3 + $0x318] sm:$0xf0]  ;;  %v3054_v46 = vld [vmem:[%s4548_s3 + $0xe4] sm:$0xf]  ;;  %v2721_v54 = vld [vmem:[%s4548_s3 + $0xf0] sm:$0xf0] }
 0x19b   : > { %1382 = vmatpush.bf16.msrb.mxu2 %v2476_v31  ;;  %1312 = vmatmul.bf16.vlgmr.msra.gmra.mxu0 %v3894_v56  ;;  %v2396_v31 = vor.u32 %v3099_v21, %v2393_v22  ;;  %v2492_v60 = vor.u32 %v3123_v7, %v2489_v48  ;;  %v3082_v42 = vld [vmem:[%s4548_s3 + $0x1c4] sm:$0xf]  ;;  %v2833_v11 = vld [vmem:[%s4548_s3 + $0x1d0] sm:$0xf0]  ;;  %v2655_v2 = vld [vmem:[%s4548_s3 + $0x60] sm:$0xf] }
 0x19c   : > { %1323 = vmatpush.bf16.msra.mxu1 %v2496_v1  ;;  %1356 = vmatpush.bf16.msrb.mxu0 %v2472_v26  ;;  %v2407_v1 = vld [vmem:[%s4548_s3 + $0x268] sm:$0xf]  ;;  %v2392_v26 = vor.u32 %v3101_v15, %v2391_v14  ;;  %v2815_v14 = vld [vmem:[%s4548_s3 + $0x1a0] sm:$0xf]  ;;  %v2836_v15 = vor.u32 %v3082_v42, %v2833_v11  ;;  %v3078_v21 = vld [vmem:[%s4548_s3 + $0x1a4] sm:$0xf] }
 0x19d   : > { %1350 = vmatpush.bf16.msra.mxu3 %v2484_v25  ;;  %v2408_v10 = vor.u32 %v3105_v3, %v2407_v1  ;;  %v2521_v25 = vld [vmem:[%s4548_s3 + $0x358] sm:$0xf0]  ;;  %v2831_v1 = vld [vmem:[%s4548_s3 + $0x1c0] sm:$0xf]  ;;  %v2852_v3 = vor.u32 %v3086_v16, %v2849_v59  ;;  %v2817_v22 = vld [vmem:[%s4548_s3 + $0x1b0] sm:$0xf0] }
 0x19e   : > { %v2832_v9 = vor.u32 %v3084_v4, %v2831_v1  ;;  %v2639_v48 = vld [vmem:[%s4548_s3 + $0x40] sm:$0xf]  ;;  %v2625_v1 = vld [vmem:[%s4548_s3 + $0x30] sm:$0xf0]  ;;  %v3028_v42 = vld [vmem:[%s4548_s3 + $0xc] sm:$0xf0] }
 0x19f   : > { %1383 = vmatpush.bf16.msrb.mxu2 %v2460_v43  ;;  %v2504_v43 = vor.u32 %v3129_v36, %v2503_v35  ;;  %v2673_v35 = vld [vmem:[%s4548_s3 + $0x90] sm:$0xf0] }
 0x1a0   : > { %1324 = vmatpush.bf16.msra.mxu1 %v2480_v47  ;;  %1357 = vmatpush.bf16.msrb.mxu0 %v2456_v33  ;;  %v3133_v47 = vld [vmem:[%s4548_s3 + $0x354] sm:$0xf0]  ;;  %v2376_v33 = vor.u32 %v3097_v34, %v2375_v32  ;;  %v2820_v32 = vor.u32 %v3078_v21, %v2817_v22  ;;  %v3042_v34 = vld [vmem:[%s4548_s3 + $0x84] sm:$0xf]  ;;  %v2801_v36 = vld [vmem:[%s4548_s3 + $0x190] sm:$0xf0] }
 0x1a1   : > { %1395 = vmatpush.bf16.msrb.mxu3 %v2604_v28  ;;  %v2524_v28 = vor.u32 %v3131_v23, %v2521_v25  ;;  %v2676_v38 = vor.u32 %v3042_v34, %v2673_v35  ;;  %v2753_v4 = vld [vmem:[%s4548_s3 + $0x130] sm:$0xf0]  ;;  %v2855_v21 = vld [vmem:[%s4548_s3 + $0x1e8] sm:$0xf] }
 0x1a2   : > { %1351 = vmatmul.bf16.vlgmr.msra.gmra.mxu3 %v3896_v57 }
 0x1a3   : > { %1325 = vmatmul.bf16.vlgmr.msra.gmra.mxu1 %v3896_v57  ;;  %1384 = vmatpush.bf16.msrb.mxu2 %v2444_v53  ;;  %v3088_v53 = vld [vmem:[%s4548_s3 + $0x1ec] sm:$0xf0] }
 0x1a4   : > { %1369 = vmatpush.bf16.msrb.mxu1 %v2600_v27  ;;  %1358 = vmatpush.bf16.msrb.mxu0 %v2440_v49  ;;  %v2520_v27 = vor.u32 %v3133_v47, %v2519_v17  ;;  %v2719_v49 = vld [vmem:[%s4548_s3 + $0xe0] sm:$0xf]  ;;  %v2848_v63 = vor.u32 %v3088_v53, %v2847_v52  ;;  %v3080_v17 = vld [vmem:[%s4548_s3 + $0x1ac] sm:$0xf0]  ;;  %v2689_v47 = vld [vmem:[%s4548_s3 + $0xb0] sm:$0xf0] }
 0x1a5   : > { %1396 = vmatpush.bf16.msrb.mxu3 %v2588_v19  ;;  %v3091_v19 = vld [vmem:[%s4548_s3 + $0x20c] sm:$0xf]  ;;  %v2816_v25 = vor.u32 %v3080_v17, %v2815_v14  ;;  %v3034_v53 = vld [vmem:[%s4548_s3 + $0x44] sm:$0xf]  ;;  %v2609_v14 = vld [vmem:[%s4548_s3 + $0x10] sm:$0xf0] }
 0x1a6   : > { %v2737_v17 = vld [vmem:[%s4548_s3 + $0x110] sm:$0xf0] }
 0x1a7   : > { %1385 = vmatpush.bf16.msrb.mxu2 %v2428_v0  ;;  %v3052_v0 = vld [vmem:[%s4548_s3 + $0xcc] sm:$0xf0] }
 0x1a8   : > { %1370 = vmatpush.bf16.msrb.mxu1 %v2584_v40  ;;  %1359 = vmatpush.bf16.msrb.mxu0 %v2424_v50  ;;  %v3093_v40 = vld [vmem:[%s4548_s3 + $0x214] sm:$0xf0]  ;;  %v2724_v50 = vor.u32 %v3054_v46, %v2721_v54  ;;  %v2641_v46 = vld [vmem:[%s4548_s3 + $0x50] sm:$0xf0]  ;;  %v3066_v54 = vld [vmem:[%s4548_s3 + $0x144] sm:$0xf] }
 0x1a9   : > { %1397 = vmatpush.bf16.msrb.mxu3 %v2572_v58  ;;  %v2360_v20 = vor.u32 %v3093_v40, %v2359_v39  ;;  %v2364_v58 = vor.u32 %v3091_v19, %v2361_v24  ;;  %v2783_v39 = vld [vmem:[%s4548_s3 + $0x160] sm:$0xf]  ;;  %v2785_v19 = vld [vmem:[%s4548_s3 + $0x170] sm:$0xf0]  ;;  %v2644_v59 = vor.u32 %v3034_v53, %v2641_v46  ;;  %v3047_v53 = vld [vmem:[%s4548_s3 + $0xac] sm:$0xf] }
 0x1aa   : > { %v2788_v52 = vor.u32 %v3070_v45, %v2785_v19  ;;  %v3083_v45 = vld [vmem:[%s4548_s3 + $0x1cc] sm:$0xf]  ;;  %v2841_v19 = vld [vmem:[%s4548_s3 + $0x1d8] sm:$0xf0] }
 0x1ab   : > { %1386 = vmatpush.bf16.msrb.mxu2 %v2412_v13  ;;  %v3048_v13 = vld [vmem:[%s4548_s3 + $0xac] sm:$0xf0]  ;;  %v2697_v46 = vld [vmem:[%s4548_s3 + $0xb8] sm:$0xf0] }
 0x1ac   : > { %1371 = vmatpush.bf16.msrb.mxu1 %v2568_v51  ;;  %1360 = vmatpush.bf16.msrb.mxu0 %v2408_v10  ;;  %v3056_v51 = vld [vmem:[%s4548_s3 + $0xec] sm:$0xf0] }
 0x1ad   : > { %1398 = vmatpush.bf16.msrb.mxu3 %v2556_v5  ;;  %v2720_v61 = vor.u32 %v3056_v51, %v2719_v49  ;;  %v3050_v5 = vld [vmem:[%s4548_s3 + $0xc4] sm:$0xf]  ;;  %v3036_v49 = vld [vmem:[%s4548_s3 + $0x4c] sm:$0xf0]  ;;  %v2767_v51 = vld [vmem:[%s4548_s3 + $0x140] sm:$0xf] }
 0x1ae   : > { %v2708_v10 = vor.u32 %v3050_v5, %v2705_v6  ;;  %v2607_v6 = vld [vmem:[%s4548_s3] sm:$0xf] }
 0x1af   : > { %1387 = vmatpush.bf16.msrb.mxu2 %v2396_v31  ;;  %v3044_v31 = vld [vmem:[%s4548_s3 + $0x8c] sm:$0xf0]  ;;  %v2608_v22 = vor.u32 %v3028_v42, %v2607_v6 }
 0x1b0   : > { %1372 = vmatpush.bf16.msrb.mxu1 %v2552_v41  ;;  %1361 = vmatpush.bf16.msrb.mxu0 %v2392_v26  ;;  %v2703_v41 = vld [vmem:[%s4548_s3 + $0xc0] sm:$0xf] }
 0x1b1   : > { %1399 = vmatpush.bf16.msrb.mxu3 %v2540_v18  ;;  %v2704_v8 = vor.u32 %v3052_v0, %v2703_v41  ;;  %v3046_v18 = vld [vmem:[%s4548_s3 + $0xa4] sm:$0xf]  ;;  %v3064_v41 = vld [vmem:[%s4548_s3 + $0x12c] sm:$0xf0] }
 0x1b2   : > { %v2692_v26 = vor.u32 %v3046_v18, %v2689_v47  ;;  %v3030_v0 = vld [vmem:[%s4548_s3 + $0x24] sm:$0xf]  ;;  %v2727_v18 = vld [vmem:[%s4548_s3 + $0xe8] sm:$0xf]  ;;  %v3057_v47 = vld [vmem:[%s4548_s3 + $0xf4] sm:$0xf0] }
 0x1b3   : > { %1388 = vmatpush.bf16.msrb.mxu2 %v2380_v29  ;;  %v3038_v29 = vld [vmem:[%s4548_s3 + $0x64] sm:$0xf]  ;;  %v2728_v35 = vor.u32 %v3057_v47, %v2727_v18 }
 0x1b4   : > { %1373 = vmatpush.bf16.msrb.mxu1 %v2536_v12  ;;  %1362 = vmatpush.bf16.msrb.mxu0 %v2376_v33  ;;  %v2687_v12 = vld [vmem:[%s4548_s3 + $0xa0] sm:$0xf]  ;;  %v3040_v33 = vld [vmem:[%s4548_s3 + $0x6c] sm:$0xf0]  ;;  %v2660_v7 = vor.u32 %v3038_v29, %v2657_v44  ;;  %v2713_v29 = vld [vmem:[%s4548_s3 + $0xd8] sm:$0xf0] }
 0x1b5   : > { %1400 = vmatpush.bf16.msrb.mxu3 %v2524_v28  ;;  %v2688_v23 = vor.u32 %v3048_v13, %v2687_v12  ;;  %v3074_v28 = vld [vmem:[%s4548_s3 + $0x184] sm:$0xf] }
 0x1b6   : > { %v2804_v40 = vor.u32 %v3074_v28, %v2801_v36  ;;  %v3026_v12 = vld [vmem:[%s4548_s3 + $0x4] sm:$0xf]  ;;  %v848_v28 = vld [vmem:[#allocation2 + $0x8] sm:$0xff] }
 0x1b7   : > { %1389 = vmatpush.bf16.msrb.mxu2 %v2364_v58  ;;  %v2640_v58 = vor.u32 %v3036_v49, %v2639_v48  ;;  %v4253_v44 = vpack.c.bf16 %v848_v28, %v848_v28  ;;  %v2695_v48 = vld [vmem:[%s4548_s3 + $0xa8] sm:$0xf]  ;;  %v3049_v49 = vld [vmem:[%s4548_s3 + $0xb4] sm:$0xf0] }
 0x1b8   : > { %1374 = vmatpush.bf16.msrb.mxu1 %v2520_v27  ;;  %1363 = vmatpush.bf16.msrb.mxu0 %v2360_v20  ;;  %v2671_v27 = vld [vmem:[%s4548_s3 + $0x80] sm:$0xf]  ;;  %v3068_v20 = vld [vmem:[%s4548_s3 + $0x14c] sm:$0xf0] }
 0x1b9   : > { %1401 = vmatpush.bf16.msrb.mxu3 %v2508_v62  ;;  %v2672_v37 = vor.u32 %v3044_v31, %v2671_v27  ;;  %v2656_v62 = vor.u32 %v3040_v33, %v2655_v2  ;;  %v2768_v16 = vor.u32 %v3068_v20, %v2767_v51  ;;  %v2612_v31 = vor.u32 %v3026_v12, %v2609_v14  ;;  %v2839_v2 = vld [vmem:[%s4548_s3 + $0x1c8] sm:$0xf]  ;;  %v3081_v20 = vld [vmem:[%s4548_s3 + $0x1b4] sm:$0xf0]  ;;  %v2665_v14 = vld [vmem:[%s4548_s3 + $0x78] sm:$0xf0] }
 0x1ba   : > { %1390 = vmatmul.bf16.vlgmr.msrb.gmra.mxu2 %v3894_v56  ;;  %v2823_v51 = vld [vmem:[%s4548_s3 + $0x1a8] sm:$0xf]  ;;  %v3073_v12 = vld [vmem:[%s4548_s3 + $0x174] sm:$0xf0] }
 0x1bb   : > { %1754 = vmatpush.bf16.msra.mxu2 %v2724_v50  ;;  %1364 = vmatmul.bf16.vlgmr.msrb.gmra.mxu0 %v3894_v56  ;;  %v2799_v56 = vld [vmem:[%s4548_s3 + $0x180] sm:$0xf] }
 0x1bc   : > { %1375 = vmatpush.bf16.msrb.mxu1 %v2504_v43  ;;  %1728 = vmatpush.bf16.msra.mxu0 %v2720_v61  ;;  %v3072_v43 = vld [vmem:[%s4548_s3 + $0x16c] sm:$0xf0] }
 0x1bd   : > { %1402 = vmatpush.bf16.msrb.mxu3 %v2492_v60  ;;  %v2784_v24 = vor.u32 %v3072_v43, %v2783_v39  ;;  %v2623_v60 = vld [vmem:[%s4548_s3 + $0x20] sm:$0xf]  ;;  %v3032_v61 = vld [vmem:[%s4548_s3 + $0x2c] sm:$0xf0]  ;;  %v3051_v43 = vld [vmem:[%s4548_s3 + $0xcc] sm:$0xf] }
 0x1be   : > { %v2624_v5 = vor.u32 %v3032_v61, %v2623_v60  ;;  %v2679_v60 = vld [vmem:[%s4548_s3 + $0x88] sm:$0xf]  ;;  %v3045_v61 = vld [vmem:[%s4548_s3 + $0x94] sm:$0xf0] }
 0x1bf   : > { %1755 = vmatpush.bf16.msra.mxu2 %v2708_v10  ;;  %v3060_v10 = vld [vmem:[%s4548_s3 + $0x10c] sm:$0xf0] }
 0x1c0   : > { %1376 = vmatpush.bf16.msrb.mxu1 %v2488_v55  ;;  %1729 = vmatpush.bf16.msra.mxu0 %v2704_v8  ;;  %v2769_v55 = vld [vmem:[%s4548_s3 + $0x150] sm:$0xf0]  ;;  %v2628_v8 = vor.u32 %v3030_v0, %v2625_v1  ;;  %v3043_v0 = vld [vmem:[%s4548_s3 + $0x8c] sm:$0xf]  ;;  %v2681_v1 = vld [vmem:[%s4548_s3 + $0x98] sm:$0xf0] }
 0x1c1   : > { %1767 = vmatpush.bf16.msra.mxu3 %v2852_v3  ;;  %v2772_v50 = vor.u32 %v3066_v54, %v2769_v55  ;;  %v3062_v3 = vld [vmem:[%s4548_s3 + $0x124] sm:$0xf]  ;;  %v3079_v54 = vld [vmem:[%s4548_s3 + $0x1ac] sm:$0xf]  ;;  %v2825_v55 = vld [vmem:[%s4548_s3 + $0x1b8] sm:$0xf0]  ;;  %v2684_v42 = vor.u32 %v3043_v0, %v2681_v1 }
 0x1c2   : > { %1403 = vmatmul.bf16.vlgmr.msrb.gmra.mxu3 %v3896_v57  ;;  %v2756_v13 = vor.u32 %v3062_v3, %v2753_v4  ;;  %v3075_v3 = vld [vmem:[%s4548_s3 + $0x18c] sm:$0xf]  ;;  %v2809_v4 = vld [vmem:[%s4548_s3 + $0x198] sm:$0xf0] }
 0x1c3   : > { %1377 = vmatmul.bf16.vlgmr.msrb.gmra.mxu1 %v3896_v57  ;;  %v3076_v57 = vld [vmem:[%s4548_s3 + $0x18c] sm:$0xf0]  ;;  %1756 = vmatpush.bf16.msra.mxu2 %v2692_v26  ;;  %v2729_v26 = vld [vmem:[%s4548_s3 + $0xf8] sm:$0xf0] }
 0x1c4   : > { %1741 = vmatpush.bf16.msra.mxu1 %v2848_v63  ;;  %1730 = vmatpush.bf16.msra.mxu0 %v2688_v23  ;;  %v2800_v30 = vor.u32 %v3076_v57, %v2799_v56  ;;  %v2751_v63 = vld [vmem:[%s4548_s3 + $0x120] sm:$0xf]  ;;  %v3089_v23 = vld [vmem:[%s4548_s3 + $0x1f4] sm:$0xf0]  ;;  %v3087_v56 = vld [vmem:[%s4548_s3 + $0x1ec] sm:$0xf] }
 0x1c5   : > { %1768 = vmatpush.bf16.msra.mxu3 %v2836_v15  ;;  %v2752_v11 = vor.u32 %v3064_v41, %v2751_v63  ;;  %v3058_v15 = vld [vmem:[%s4548_s3 + $0x104] sm:$0xf]  ;;  %v2856_v36 = vor.u32 %v3089_v23, %v2855_v21  ;;  %v2807_v63 = vld [vmem:[%s4548_s3 + $0x188] sm:$0xf]  ;;  %v3077_v41 = vld [vmem:[%s4548_s3 + $0x194] sm:$0xf0] }
 0x1c6   : > { %v847_v57 = vld [vmem:[#allocation2] sm:$0xff]  ;;  %v2740_v34 = vor.u32 %v3058_v15, %v2737_v17  ;;  %v2808_v6 = vor.u32 %v3077_v41, %v2807_v63  ;;  %v3071_v15 = vld [vmem:[%s4548_s3 + $0x16c] sm:$0xf]  ;;  %v2793_v17 = vld [vmem:[%s4548_s3 + $0x178] sm:$0xf0] }
 0x1c7   : > { %1757 = vmatpush.bf16.msra.mxu2 %v2676_v38  ;;  %v3053_v38 = vld [vmem:[%s4548_s3 + $0xd4] sm:$0xf0]  ;;  %v4242_v39 = vpack.c.bf16 %v847_v57, %v847_v57  ;;  %v2777_v57 = vld [vmem:[%s4548_s3 + $0x158] sm:$0xf0]  ;;  %v3167_v41 = vld [vmem:[%s4549_s4 + $0x68] sm:$0xff] }
 0x1c8   : > { %1742 = vmatpush.bf16.msra.mxu1 %v2832_v9  ;;  %1731 = vmatpush.bf16.msra.mxu0 %v2672_v37  ;;  %v2735_v9 = vld [vmem:[%s4548_s3 + $0x100] sm:$0xf]  ;;  %v3037_v23 = vld [vmem:[%s4548_s3 + $0x54] sm:$0xf0] }
 0x1c9   : > { %1769 = vmatpush.bf16.msra.mxu3 %v2820_v32  ;;  %v2736_v27 = vor.u32 %v3060_v10, %v2735_v9  ;;  %v2857_v32 = vld [vmem:[%s4548_s3 + $0x1f8] sm:$0xf0]  ;;  %v2791_v9 = vld [vmem:[%s4548_s3 + $0x168] sm:$0xf]  ;;  %v2812_v10 = vor.u32 %v3075_v3, %v2809_v4 }
 0x1ca   : > { %v2860_v33 = vor.u32 %v3087_v56, %v2857_v32  ;;  %v2792_v47 = vor.u32 %v3073_v12, %v2791_v9  ;;  %v2649_v56 = vld [vmem:[%s4548_s3 + $0x58] sm:$0xf0]  ;;  %v3067_v32 = vld [vmem:[%s4548_s3 + $0x14c] sm:$0xf]  ;;  %v3156_v9 = vld [vmem:[%s4549_s4 + $0x10] sm:$0xff] }
 0x1cb   : > { %1758 = vmatpush.bf16.msra.mxu2 %v2660_v7  ;;  %v2716_v7 = vor.u32 %v3051_v43, %v2713_v29  ;;  %v3063_v43 = vld [vmem:[%s4548_s3 + $0x12c] sm:$0xf]  ;;  %v2761_v29 = vld [vmem:[%s4548_s3 + $0x138] sm:$0xf0] }
 0x1cc   : > { %1743 = vmatpush.bf16.msra.mxu1 %v2816_v25  ;;  %1732 = vmatpush.bf16.msra.mxu0 %v2656_v62  ;;  %v3055_v25 = vld [vmem:[%s4548_s3 + $0xec] sm:$0xf]  ;;  %v3157_v1 = vld [vmem:[%s4549_s4 + $0x18] sm:$0xff] }
 0x1cd   : > { %1770 = vmatpush.bf16.msra.mxu3 %v2804_v40  ;;  %v2732_v37 = vor.u32 %v3055_v25, %v2729_v26  ;;  %v3085_v40 = vld [vmem:[%s4548_s3 + $0x1d4] sm:$0xf0]  ;;  %v2775_v25 = vld [vmem:[%s4548_s3 + $0x148] sm:$0xf]  ;;  %v2796_v26 = vor.u32 %v3071_v15, %v2793_v17  ;;  %v3164_v15 = vld [vmem:[%s4549_s4 + $0x50] sm:$0xff] }
 0x1ce   : > { %v3165_v12 = vld [vmem:[%s4549_s4 + $0x58] sm:$0xff]  ;;  %v3154_v17 = vld [vmem:[%s4549_s4] sm:$0xff] }
 0x1cf   : > { %1759 = vmatpush.bf16.msra.mxu2 %v2644_v59  ;;  %v2700_v59 = vor.u32 %v3047_v53, %v2697_v46  ;;  %v3059_v53 = vld [vmem:[%s4548_s3 + $0x10c] sm:$0xf]  ;;  %v2745_v46 = vld [vmem:[%s4548_s3 + $0x118] sm:$0xf0] }
 0x1d0   : > { %1744 = vmatpush.bf16.msra.mxu1 %v2800_v30  ;;  %1733 = vmatpush.bf16.msra.mxu0 %v2640_v58  ;;  %v2711_v30 = vld [vmem:[%s4548_s3 + $0xc8] sm:$0xf]  ;;  %v2696_v58 = vor.u32 %v3049_v49, %v2695_v48  ;;  %v2764_v49 = vor.u32 %v3063_v43, %v2761_v29 }
 0x1d1   : > { %1771 = vmatpush.bf16.msra.mxu3 %v2788_v52  ;;  %v2712_v62 = vor.u32 %v3053_v38, %v2711_v30  ;;  %v2844_v52 = vor.u32 %v3083_v45, %v2841_v19  ;;  %v2759_v30 = vld [vmem:[%s4548_s3 + $0x128] sm:$0xf]  ;;  %v2780_v38 = vor.u32 %v3067_v32, %v2777_v57 }
 0x1d2   : > { %v2743_v48 = vld [vmem:[%s4548_s3 + $0x108] sm:$0xf] }
 0x1d3   : > { %1760 = vmatpush.bf16.msra.mxu2 %v2628_v8  ;;  %v3041_v8 = vld [vmem:[%s4548_s3 + $0x74] sm:$0xf0]  ;;  %v3175_v32 = vld [vmem:[%s4549_s4 + $0xa8] sm:$0xff] }
 0x1d4   : > { %1745 = vmatpush.bf16.msra.mxu1 %v2784_v24  ;;  %1734 = vmatpush.bf16.msra.mxu0 %v2624_v5  ;;  %v2840_v24 = vor.u32 %v3085_v40, %v2839_v2  ;;  %v2680_v5 = vor.u32 %v3045_v61, %v2679_v60  ;;  %v3065_v2 = vld [vmem:[%s4548_s3 + $0x134] sm:$0xf0]  ;;  %v2633_v40 = vld [vmem:[%s4548_s3 + $0x38] sm:$0xf0]  ;;  %v3160_v60 = vld [vmem:[%s4549_s4 + $0x30] sm:$0xff] }
 0x1d5   : > { %1772 = vmatpush.bf16.msra.mxu3 %v2772_v50  ;;  %v2828_v50 = vor.u32 %v3079_v54, %v2825_v55  ;;  %v2760_v19 = vor.u32 %v3065_v2, %v2759_v30  ;;  %v3169_v61 = vld [vmem:[%s4549_s4 + $0x78] sm:$0xff]  ;;  %v3172_v30 = vld [vmem:[%s4549_s4 + $0x90] sm:$0xff] }
 0x1d7   : > { %1761 = vmatpush.bf16.msra.mxu2 %v2612_v31  ;;  %v3035_v31 = vld [vmem:[%s4548_s3 + $0x4c] sm:$0xf] }
 0x1d8   : > { %1746 = vmatpush.bf16.msra.mxu1 %v2768_v16  ;;  %1735 = vmatpush.bf16.msra.mxu0 %v2608_v22  ;;  %v2824_v16 = vor.u32 %v3081_v20, %v2823_v51  ;;  %v2647_v22 = vld [vmem:[%s4548_s3 + $0x48] sm:$0xf]  ;;  %v2652_v28 = vor.u32 %v3035_v31, %v2649_v56  ;;  %v3061_v51 = vld [vmem:[%s4548_s3 + $0x114] sm:$0xf0]  ;;  %v2617_v20 = vld [vmem:[%s4548_s3 + $0x18] sm:$0xf0] }
 0x1d9   : > { %1773 = vmatpush.bf16.msra.mxu3 %v2756_v13  ;;  %v3039_v13 = vld [vmem:[%s4548_s3 + $0x6c] sm:$0xf]  ;;  %v2744_v55 = vor.u32 %v3061_v51, %v2743_v48  ;;  %v3185_v31 = vld [vmem:[%s4549_s4 + $0xf8] sm:$0xff]  ;;  %v3170_v48 = vld [vmem:[%s4549_s4 + $0x80] sm:$0xff] }
 0x1da   : > { %1762 = vmatmul.bf16.vlgmr.msra.gmra.mxu2 %v4242_v39  ;;  %v2668_v21 = vor.u32 %v3039_v13, %v2665_v14  ;;  %v3155_v14 = vld [vmem:[%s4549_s4 + $0x8] sm:$0xff] }
 0x1db   : > { %1806 = vmatpush.bf16.msrb.mxu2 %v2732_v37  ;;  %1736 = vmatmul.bf16.vlgmr.msra.gmra.mxu0 %v4242_v39  ;;  %v3033_v37 = vld [vmem:[%s4548_s3 + $0x34] sm:$0xf0] }
 0x1dc   : > { %1747 = vmatpush.bf16.msra.mxu1 %v2752_v11  ;;  %1780 = vmatpush.bf16.msrb.mxu0 %v2728_v35  ;;  %v2663_v11 = vld [vmem:[%s4548_s3 + $0x68] sm:$0xf] }
 0x1dd   : > { %1774 = vmatpush.bf16.msra.mxu3 %v2740_v34  ;;  %v2664_v18 = vor.u32 %v3041_v8, %v2663_v11  ;;  %v2648_v34 = vor.u32 %v3037_v23, %v2647_v22  ;;  %v3163_v23 = vld [vmem:[%s4549_s4 + $0x48] sm:$0xff] }
 0x1df   : > { %1807 = vmatpush.bf16.msrb.mxu2 %v2716_v7  ;;  %v3029_v7 = vld [vmem:[%s4548_s3 + $0x14] sm:$0xf0] }
 0x1e0   : > { %1748 = vmatpush.bf16.msra.mxu1 %v2736_v27  ;;  %1775 = vmatmul.bf16.vlgmr.msra.gmra.mxu3 %v4253_v44  ;;  %v3069_v27 = vld [vmem:[%s4548_s3 + $0x154] sm:$0xf0] }
 0x1e1   : > { %1819 = vmatpush.bf16.msrb.mxu3 %v2860_v33  ;;  %1781 = vmatpush.bf16.msrb.mxu0 %v2712_v62  ;;  %v2776_v35 = vor.u32 %v3069_v27, %v2775_v25  ;;  %v3031_v33 = vld [vmem:[%s4548_s3 + $0x2c] sm:$0xf]  ;;  %v3162_v27 = vld [vmem:[%s4549_s4 + $0x40] sm:$0xff] }
 0x1e2   : > { %v2636_v62 = vor.u32 %v3031_v33, %v2633_v40  ;;  %v3181_v33 = vld [vmem:[%s4549_s4 + $0xd8] sm:$0xff] }
 0x1e3   : > { %1749 = vmatmul.bf16.vlgmr.msra.gmra.mxu1 %v4253_v44  ;;  %1808 = vmatpush.bf16.msrb.mxu2 %v2700_v59  ;;  %v3161_v59 = vld [vmem:[%s4549_s4 + $0x38] sm:$0xff] }
 0x1e4   : > { %1793 = vmatpush.bf16.msrb.mxu1 %v2856_v36  ;;  %v2631_v36 = vld [vmem:[%s4548_s3 + $0x28] sm:$0xf] }
 0x1e5   : > { %1820 = vmatpush.bf16.msrb.mxu3 %v2844_v52  ;;  %1782 = vmatpush.bf16.msrb.mxu0 %v2696_v58  ;;  %v2632_v45 = vor.u32 %v3033_v37, %v2631_v36  ;;  %v3027_v52 = vld [vmem:[%s4548_s3 + $0xc] sm:$0xf]  ;;  %v3173_v36 = vld [vmem:[%s4549_s4 + $0x98] sm:$0xff]  ;;  %v3182_v37 = vld [vmem:[%s4549_s4 + $0xe0] sm:$0xff] }
 0x1e6   : > { %v2620_v58 = vor.u32 %v3027_v52, %v2617_v20  ;;  %v3179_v20 = vld [vmem:[%s4549_s4 + $0xc8] sm:$0xff] }
 0x1e7   : > { %1809 = vmatpush.bf16.msrb.mxu2 %v2684_v42 }
 0x1e8   : > { %1794 = vmatpush.bf16.msrb.mxu1 %v2840_v24  ;;  %v2615_v24 = vld [vmem:[%s4548_s3 + $0x8] sm:$0xf] }
 0x1e9   : > { %1821 = vmatpush.bf16.msrb.mxu3 %v2828_v50  ;;  %1783 = vmatpush.bf16.msrb.mxu0 %v2680_v5  ;;  %v2616_v54 = vor.u32 %v3029_v7, %v2615_v24  ;;  %v3158_v50 = vld [vmem:[%s4549_s4 + $0x20] sm:$0xff]  ;;  %v3180_v24 = vld [vmem:[%s4549_s4 + $0xd0] sm:$0xff] }
 0x1ea   : > { %v3166_v5 = vld [vmem:[%s4549_s4 + $0x60] sm:$0xff] }
 0x1eb   : > { %1810 = vmatpush.bf16.msrb.mxu2 %v2668_v21 }
 0x1ec   : > { %1795 = vmatpush.bf16.msrb.mxu1 %v2824_v16  ;;  %v2748_v16 = vor.u32 %v3059_v53, %v2745_v46 }
 0x1ed   : > { %1822 = vmatpush.bf16.msrb.mxu3 %v2812_v10  ;;  %1784 = vmatpush.bf16.msrb.mxu0 %v2664_v18 }
 0x1ef   : > { %1811 = vmatpush.bf16.msrb.mxu2 %v2652_v28  ;;  %v3183_v28 = vld [vmem:[%s4549_s4 + $0xe8] sm:$0xff] }
 0x1f0   : > { %1796 = vmatpush.bf16.msrb.mxu1 %v2808_v6 }
 0x1f1   : > { %1823 = vmatpush.bf16.msrb.mxu3 %v2796_v26  ;;  %1785 = vmatpush.bf16.msrb.mxu0 %v2648_v34  ;;  %v3176_v26 = vld [vmem:[%s4549_s4 + $0xb0] sm:$0xff] }
 0x1f2   : > { %v3184_v34 = vld [vmem:[%s4549_s4 + $0xf0] sm:$0xff] }
 0x1f3   : > { %1812 = vmatpush.bf16.msrb.mxu2 %v2636_v62 }
 0x1f4   : > { %1797 = vmatpush.bf16.msrb.mxu1 %v2792_v47  ;;  %v3177_v47 = vld [vmem:[%s4549_s4 + $0xb8] sm:$0xff] }
 0x1f5   : > { %1824 = vmatpush.bf16.msrb.mxu3 %v2780_v38  ;;  %1786 = vmatpush.bf16.msrb.mxu0 %v2632_v45  ;;  %v845_v38 = vld [vmem:[%s4550_s5 + $0x3] sm:$0xf] }
 0x1f6   : > { %v1833_v45 = vperm.slane %v845_v38, 0 }
 0x1f7   : > { %1813 = vmatpush.bf16.msrb.mxu2 %v2620_v58 }
 0x1f8   : > { %1798 = vmatpush.bf16.msrb.mxu1 %v2776_v35  ;;  %v3174_v35 = vld [vmem:[%s4549_s4 + $0xa0] sm:$0xff] }
 0x1f9   : > { %1825 = vmatpush.bf16.msrb.mxu3 %v2764_v49  ;;  %1787 = vmatpush.bf16.msrb.mxu0 %v2616_v54  ;;  %v1834_v54 = vperm.slane %v845_v38, 1 }
 0x1fa   : > { %1814 = vmatmul.bf16.vlgmr.msrb.gmra.mxu2 %v4242_v39 }
 0x1fb   : > { %2138 = vmatpush.bf16.msra.mxu2 %v3177_v47 }
 0x1fc   : > { %1799 = vmatpush.bf16.msrb.mxu1 %v2760_v19  ;;  %1788 = vmatmul.bf16.vlgmr.msrb.gmra.mxu0 %v4242_v39  ;;  %v3159_v39 = vld [vmem:[%s4549_s4 + $0x28] sm:$0xff] }
 0x1fd   : > { %1826 = vmatpush.bf16.msrb.mxu3 %v2748_v16  ;;  %2112 = vmatpush.bf16.msra.mxu0 %v3161_v59  ;;  %v3171_v19 = vld [vmem:[%s4549_s4 + $0x88] sm:$0xff] }
 0x1ff   : > { %2139 = vmatpush.bf16.msra.mxu2 %v3176_v26 }
 0x200   : > { %1800 = vmatpush.bf16.msrb.mxu1 %v2744_v55  ;;  %1827 = vmatmul.bf16.vlgmr.msrb.gmra.mxu3 %v4253_v44 }
 0x201   : > { %2113 = vmatpush.bf16.msra.mxu0 %v3160_v60  ;;  %2151 = vmatpush.bf16.msra.mxu3 %v3185_v31  ;;  %v3178_v60 = vld [vmem:[%s4549_s4 + $0xc0] sm:$0xff] }
 0x203   : > { %1801 = vmatmul.bf16.vlgmr.msrb.gmra.mxu1 %v4253_v44  ;;  %v3168_v44 = vld [vmem:[%s4549_s4 + $0x70] sm:$0xff]  ;;  %2140 = vmatpush.bf16.msra.mxu2 %v3175_v32 }
 0x204   : > { %2125 = vmatpush.bf16.msra.mxu1 %v3169_v61 }
 0x205   : > { %2114 = vmatpush.bf16.msra.mxu0 %v3159_v39  ;;  %2152 = vmatpush.bf16.msra.mxu3 %v3184_v34 }
 0x207   : > { %2141 = vmatpush.bf16.msra.mxu2 %v3174_v35 }
 0x208   : > { %2126 = vmatpush.bf16.msra.mxu1 %v3168_v44 }
 0x209   : > { %2115 = vmatpush.bf16.msra.mxu0 %v3158_v50  ;;  %2153 = vmatpush.bf16.msra.mxu3 %v3183_v28 }
 0x20b   : > { %2142 = vmatpush.bf16.msra.mxu2 %v3173_v36 }
 0x20c   : > { %2127 = vmatpush.bf16.msra.mxu1 %v3167_v41 }
 0x20d   : > { %2116 = vmatpush.bf16.msra.mxu0 %v3157_v1  ;;  %2154 = vmatpush.bf16.msra.mxu3 %v3182_v37 }
 0x20f   : > { %2143 = vmatpush.bf16.msra.mxu2 %v3172_v30 }
 0x210   : > { %2128 = vmatpush.bf16.msra.mxu1 %v3166_v5 }
 0x211   : > { %2117 = vmatpush.bf16.msra.mxu0 %v3156_v9  ;;  %2155 = vmatpush.bf16.msra.mxu3 %v3181_v33 }
 0x213   : > { %2144 = vmatpush.bf16.msra.mxu2 %v3171_v19 }
 0x214   : > { %2129 = vmatpush.bf16.msra.mxu1 %v3165_v12 }
 0x215   : > { %2118 = vmatpush.bf16.msra.mxu0 %v3155_v14  ;;  %2156 = vmatpush.bf16.msra.mxu3 %v3180_v24  ;;  %v1836_v14 = vperm.slane %v845_v38, 3 }
 0x217   : > { %2145 = vmatpush.bf16.msra.mxu2 %v3170_v48 }
 0x218   : > { %v1313_v0 = vpop.f32.mrf.mxu0  ;;  %2130 = vmatpush.bf16.msra.mxu1 %v3164_v15 }
 0x219   : > { %2119 = vmatpush.bf16.msra.mxu0 %v3154_v17  ;;  %2157 = vmatpush.bf16.msra.mxu3 %v3179_v20 }
 0x21c   : > { %2131 = vmatpush.bf16.msra.mxu1 %v3163_v23 }
 0x21d   : > { %v4437_v3 = vpop.f32.mrf.mxu2  ;;  %2158 = vmatpush.bf16.msra.mxu3 %v3178_v60 }
 0x220   : > { %v1326_v63 = vpop.f32.mrf.mxu1  ;;  %v1315_v42 = vpop.f32.mrf.mxu0  ;;  %2132 = vmatpush.bf16.msra.mxu1 %v3162_v27 }
 0x221   : > { %v1327_v2 = vadd.f32 %v1326_v63, %v1313_v0 }
 0x225   : > { %v4439_v4 = vpop.f32.mrf.mxu3  ;;  %v1341_v11 = vpop.f32.mrf.mxu2 }
 0x226   : > { %v1353_v49 = vadd.f32 %v4439_v4, %v4437_v3  ;;  %v1835_v4 = vperm.slane %v845_v38, 2 }
 0x228   : > { %v1328_v6 = vpop.f32.mrf.mxu1 }
 0x22d   : > { %v1354_v8 = vpop.f32.mrf.mxu3 }
 0x238   : > { %v4447_v10 = vpop.f32.mrf.mxu0 }
 0x23d   : > { %v4463_v18 = vpop.f32.mrf.mxu2 }
 0x240   : > { %v4452_v13 = vpop.f32.mrf.mxu1  ;;  %v1367_v21 = vpop.f32.mrf.mxu0 }
 0x241   : > { %v1379_v41 = vadd.f32 %v4452_v13, %v4447_v10 }
 0x245   : > { %v4468_v22 = vpop.f32.mrf.mxu3  ;;  %v1393_v56 = vpop.f32.mrf.mxu2 }
 0x246   : > { %v1405_v42 = vadd.f32 %v4468_v22, %v4463_v18  ;;  %v3262_v22 = vld [vmem:[%s4550_s5 + $0x7] ss:$0 sm:$0xff] }
 0x248   : > { %v1380_v25 = vpop.f32.mrf.mxu1 }
 0x24d   : > { %v1406_v57 = vpop.f32.mrf.mxu3 }
 0x258   : > { %v1737_v40 = vpop.f32.mrf.mxu0 }
 0x259   : > { %v1738_v43 = vadd.f32 %v1737_v40, %v1327_v2 }
 0x25d   : > { %v1763_v52 = vpop.f32.mrf.mxu2 }
 0x25e   : > { %v1764_v53 = vadd.f32 %v1763_v52, %v1353_v49 }
 0x260   : > { %v1750_v29 = vpop.f32.mrf.mxu1  ;;  %v1739_v55 = vpop.f32.mrf.mxu0 }
 0x261   : > { %v1751_v62 = vadd.f32 %v1750_v29, %v1738_v43 }
 0x263   : > { %v1841_v7 = vadd.f32 %v1833_v45, %v1751_v62  ;;  %v1776_v46 = vpop.f32.mrf.mxu3 }
 0x264   : > { %v1777_v59 = vadd.f32 %v1776_v46, %v1764_v53 }
 0x265   : > { %v1845_v51 = vmax.f32 %v1841_v7, 0.0  ;;  %v1765_v44 = vpop.f32.mrf.mxu2 }
 0x266   : > { %v1842_v61 = vadd.f32 %v1834_v54, %v1777_v59 }
 0x267   : > { %v1849_v58 = vpack.c.bf16 %v1845_v51, %v1845_v51 }
 0x268   : > { %v1752_v16 = vpop.f32.mrf.mxu1  ;;  %v1846_v39 = vmax.f32 %v1842_v61, 0.0 }
 0x269   : > { %2120 = vmatmul.bf16.vlgmr.msra.gmra.mxu0 %v1849_v58 }
 0x26a   : > { %v1850_v63 = vpack.c.bf16 %v1846_v39, %v1846_v39 }
 0x26b   : > { %v1778_v50 = vpop.f32.mrf.mxu3 }
 0x26c   : > { %2133 = vmatmul.bf16.vlgmr.msra.gmra.mxu1 %v1850_v63 }
 0x279   : > { %v1789_v0 = vpop.f32.mrf.mxu0 }
 0x27a   : > { %v1790_v1 = vadd.f32 %v1789_v0, %v1379_v41 }
 0x27d   : > { %v1815_v8 = vpop.f32.mrf.mxu2 }
 0x27e   : > { %v1816_v9 = vadd.f32 %v1815_v8, %v1405_v42 }
 0x280   : > { %v1802_v3 = vpop.f32.mrf.mxu1 }
 0x281   : > { %v1803_v5 = vadd.f32 %v1802_v3, %v1790_v1  ;;  %v1791_v15 = vpop.f32.mrf.mxu0 }
 0x283   : > { %v1843_v6 = vadd.f32 %v1835_v4, %v1803_v5  ;;  %v1828_v12 = vpop.f32.mrf.mxu3 }
 0x284   : > { %v1829_v21 = vadd.f32 %v1828_v12, %v1816_v9 }
 0x285   : > { %v1847_v11 = vmax.f32 %v1843_v6, 0.0  ;;  %v1817_v23 = vpop.f32.mrf.mxu2 }
 0x286   : > { %v1844_v10 = vadd.f32 %v1836_v14, %v1829_v21 }
 0x287   : > { %v1851_v17 = vpack.c.bf16 %v1847_v11, %v1847_v11 }
 0x288   : > { %v1804_v47 = vpop.f32.mrf.mxu1  ;;  %v1848_v13 = vmax.f32 %v1844_v10, 0.0 }
 0x289   : > { %2146 = vmatmul.bf16.vlgmr.msra.gmra.mxu2 %v1851_v17 }
 0x28a   : > { %v1852_v25 = vpack.c.bf16 %v1848_v13, %v1848_v13 }
 0x28b   : > { %v1830_v26 = vpop.f32.mrf.mxu3 }
 0x28c   : > { %2159 = vmatmul.bf16.vlgmr.msra.gmra.mxu3 %v1852_v25 }
 0x2e6   : > { %v2121_v27 = vpop.f32.mrf.mxu0 }
 0x2e7   : > { %v2122_v57 = vadd.f32 %v3262_v22, %v2121_v27 }
 0x2e9   : > { %v2134_v31 = vpop.f32.mrf.mxu1 }
 0x2ea   : > { %v2135_v34 = vadd.f32 %v2134_v31, %v2122_v57 }
 0x2ee   : > { %v2123_v56 = vpop.f32.mrf.mxu0 }
 0x2f1   : > { %v2136_v18 = vpop.f32.mrf.mxu1 }
 0x30c   : > { %v2147_v32 = vpop.f32.mrf.mxu2 }
 0x30d   : > { %v2148_v35 = vadd.f32 %v2147_v32, %v2135_v34 }
 0x30f   : > { %v2160_v28 = vpop.f32.mrf.mxu3 }
 0x310   : > { %v2161_v36 = vadd.f32 %v2160_v28, %v2148_v35 }
 0x312   : > { %2164 = vst [vmem:[%s4551_s6] sm:$0xff] %v2161_v36 }
 0x314   : > { %v2149_v37 = vpop.f32.mrf.mxu2 }
 0x317   : > { %v2162_v30 = vpop.f32.mrf.mxu3 }
 0x318 PF: > { %s16_s23 = sadd.s32 1, %s3285_s23   ;;  %s4552_s21 = smov %s3281_s22 }
 0x319   : > { %p13_p6 = scmp.ge.s32.totalorder %s16_s23, 4   ;;  %s4553_s22 = smov %s4555_s24 }
 0x31b   :  { %15 = sbr.rel (!%p13_p6) target bundleno = 2 (0x2), region = 76 }

</bundles_post_ra>
